<compile_context>
chip_gen: v6e
topology: v6e:2x2x1
jax: 0.10.0
libtpu: 0.0.40
codegen_flags: <defaults>
</compile_context>

<pallas_src>
import math

import numpy as np

import jax
import jax.numpy as jnp
from jax.experimental import pallas as pl
from jax.experimental.pallas import tpu as pltpu


# ----------------------------------------------------------------------------
# small helpers
# ----------------------------------------------------------------------------
def _pick_tile(n, preferred, mult=8):
    """Largest tile <= preferred that divides n and is a multiple of `mult`.
    Falls back to the full extent (always legal for BlockSpec) otherwise."""
    if n <= preferred:
        return n
    for t in range(preferred, 0, -1):
        if n % t == 0 and t % mult == 0:
            return t
    return n  # TODO(synk): pad awkward extents (e.g. odd vocab sizes) instead.


def _layernorm(v, g, b, eps=1e-5):
    mu = jnp.mean(v, axis=-1, keepdims=True)
    var = jnp.mean((v - mu) ** 2, axis=-1, keepdims=True)
    return (v - mu) * jax.lax.rsqrt(var + eps) * g + b


def _query_vmem_capacity_bytes():
    try:
        return int(pltpu.get_tpu_info().vmem_capacity_bytes)  # 128 MiB v5e/v6e, 64 MiB v7x
    except Exception:
        return 128 * 2**20


_VMEM_CAP_BYTES = _query_vmem_capacity_bytes()


def _padded_block_bytes(shape, dtype):
    """Bytes for one VMEM buffer of `shape`, last two dims padded to the (8,128) vreg tile."""
    s = [1, 1] + [int(d) for d in shape]
    s[-1] = -(-s[-1] // 128) * 128
    s[-2] = -(-s[-2] // 8) * 8
    n = 1
    for d in s:
        n *= d
    return n * jnp.dtype(dtype).itemsize


def _vmem_limit(io_blocks, scratch_blocks=()):
    """Scoped-VMEM limit = double-buffered I/O blocks + scratch + margin, clamped per chip."""
    need = sum(2 * _padded_block_bytes(s, d) for s, d in io_blocks)
    need += sum(_padded_block_bytes(s, d) for s, d in scratch_blocks)
    need += 2 * 2**20                                   # compiler temporaries / headroom
    hard_cap = min(56 * 2**20, max(24 * 2**20, _VMEM_CAP_BYTES - 24 * 2**20))
    return int(min(hard_cap, max(16 * 2**20, need)))


# ----------------------------------------------------------------------------
# kernel 1: LN1 + fused QKV projection   (rows x qkv-column tiles)
# ----------------------------------------------------------------------------
def ln_qkv_kernel(x_ref, g_ref, b_ref, w_ref, qkv_ref, ln_sc):
    # LN1 activations computed once per row tile, reused for every qkv column tile.
    @pl.when(pl.program_id(1) == 0)
    def _():
        ln_sc[...] = _layernorm(x_ref[...], g_ref[...], b_ref[...]).astype(jnp.bfloat16)

    qkv_ref[...] = jnp.dot(ln_sc[...], w_ref[...],
                           preferred_element_type=jnp.float32).astype(qkv_ref.dtype)


def ln_qkv(x2d, g, b, wqkv, *, tn, tc):
    N, D = x2d.shape
    C = wqkv.shape[1]                                    # 3*D
    return pl.pallas_call(
        ln_qkv_kernel,
        out_shape=jax.ShapeDtypeStruct((N, C), jnp.bfloat16),
        grid_spec=pltpu.PrefetchScalarGridSpec(
            num_scalar_prefetch=0,
            grid=(N // tn, C // tc),
            in_specs=[
                pl.BlockSpec((tn, D), lambda i, j: (i, 0)),   # fetched once per row tile
                pl.BlockSpec((1, D), lambda i, j: (0, 0)),
                pl.BlockSpec((1, D), lambda i, j: (0, 0)),
                pl.BlockSpec((D, tc), lambda i, j: (0, j)),   # stream the weight columns
            ],
            out_specs=pl.BlockSpec((tn, tc), lambda i, j: (i, j)),
            scratch_shapes=[pltpu.VMEM((tn, D), jnp.bfloat16)],
        ),
        compiler_params=pltpu.CompilerParams(
            dimension_semantics=("parallel", "arbitrary"),
            vmem_limit_bytes=_vmem_limit(
                [((tn, D), jnp.float32), ((1, D), jnp.float32), ((1, D), jnp.float32),
                 ((D, tc), jnp.bfloat16), ((tn, tc), jnp.bfloat16)],
                [((tn, D), jnp.bfloat16)])),
        cost_estimate=pl.CostEstimate(
            flops=2 * N * D * C, transcendentals=0,
            bytes_accessed=4 * N * D + 2 * D * C + 2 * N * C),
    )(x2d, g, b, wqkv)


# ----------------------------------------------------------------------------
# kernel 2: causal flash attention over a lower-triangular (qi, ki) pair grid
# ----------------------------------------------------------------------------
def flash_attn_kernel(qi_ref, ki_ref, q_ref, k_ref, v_ref, o_ref, m_sc, l_sc, acc_sc):
    p = pl.program_id(1)
    qi = qi_ref[p]
    ki = ki_ref[p]

    @pl.when(ki == 0)
    def _():
        m_sc[...] = jnp.full_like(m_sc, -1e30)
        l_sc[...] = jnp.zeros_like(l_sc)
        acc_sc[...] = jnp.zeros_like(acc_sc)

    # 1/sqrt(Dh) is already folded into the Q columns of w_qkv (param prep).
    q = q_ref[0]                                              # (tq, Dh) bf16
    k = k_ref[0]                                              # (tk, Dh) bf16
    s = jax.lax.dot_general(q, k, (((1,), (1,)), ((), ())),
                            preferred_element_type=jnp.float32)   # (tq, tk)

    def update(scores):
        m_prev = m_sc[...]
        m_new = jnp.maximum(m_prev, jnp.max(scores, axis=-1, keepdims=True))
        alpha = jnp.exp(m_prev - m_new)
        ps = jnp.exp(scores - m_new)                          # unnormalized
        l_sc[...] = alpha * l_sc[...] + jnp.sum(ps, axis=-1, keepdims=True)
        acc_sc[...] = alpha * acc_sc[...] + jnp.dot(
            ps.astype(jnp.bfloat16), v_ref[0], preferred_element_type=jnp.float32)
        m_sc[...] = m_new

    # Strictly-below-diagonal tiles: every entry is valid -> no mask built at all.
    @pl.when(ki < qi)
    def _():
        update(s)

    # Diagonal tile (tq == tk so it is exactly ki == qi): local mask, then finalize.
    @pl.when(ki == qi)
    def _():
        row = jax.lax.broadcasted_iota(jnp.int32, s.shape, 0)
        col = jax.lax.broadcasted_iota(jnp.int32, s.shape, 1)
        update(jnp.where(col <= row, s, -1e30))
        inv_l = pl.reciprocal(l_sc[...], approx=True)
        o_ref[0] = (acc_sc[...] * inv_l).astype(o_ref.dtype)


def flash_attention(q, k, v, qi_idx, ki_idx, *, tq, tk):
    BH, T, Dh = q.shape
    n_pairs = int(qi_idx.shape[0])
    return pl.pallas_call(
        flash_attn_kernel,
        out_shape=jax.ShapeDtypeStruct((BH, T, Dh), jnp.bfloat16),
        grid_spec=pltpu.PrefetchScalarGridSpec(
            num_scalar_prefetch=2,                      # qi_idx, ki_idx -> SMEM
            grid=(BH, n_pairs),
            in_specs=[
                pl.BlockSpec((1, tq, Dh), lambda b, p, qi, ki: (b, qi[p], 0)),
                pl.BlockSpec((1, tk, Dh), lambda b, p, qi, ki: (b, ki[p], 0)),
                pl.BlockSpec((1, tk, Dh), lambda b, p, qi, ki: (b, ki[p], 0)),
            ],
            out_specs=pl.BlockSpec((1, tq, Dh), lambda b, p, qi, ki: (b, qi[p], 0)),
            scratch_shapes=[
                pltpu.VMEM((tq, 1), jnp.float32),       # running max
                pltpu.VMEM((tq, 1), jnp.float32),       # running denom
                pltpu.VMEM((tq, Dh), jnp.float32),      # output accumulator
            ],
        ),
        compiler_params=pltpu.CompilerParams(
            dimension_semantics=("parallel", "arbitrary"),
            vmem_limit_bytes=_vmem_limit(
                [((tq, Dh), jnp.bfloat16), ((tk, Dh), jnp.bfloat16),
                 ((tk, Dh), jnp.bfloat16), ((tq, Dh), jnp.bfloat16),
                 ((tq, tk), jnp.float32)],
                [((tq, 1), jnp.float32), ((tq, 1), jnp.float32),
                 ((tq, Dh), jnp.float32)])),
        cost_estimate=pl.CostEstimate(
            flops=2 * BH * T * T * Dh,                  # ~causal-halved 4*T^2*Dh
            transcendentals=BH * T * T // 2,
            bytes_accessed=6 * BH * T * Dh),
    )(qi_idx, ki_idx, q, k, v)


# ----------------------------------------------------------------------------
# kernel 3: out-proj + residual + LN2 + GELU MLP + residual (rows x hidden tiles)
# ----------------------------------------------------------------------------
def attn_out_mlp_kernel(attn_ref, x_ref, wo_ref, g_ref, b_ref, wfc_ref, wproj_ref,
                        o_ref, x1_sc, ln2_sc, acc_sc):
    h = pl.program_id(1)

    @pl.when(h == 0)
    def _():
        x1 = x_ref[...] + jnp.dot(attn_ref[...], wo_ref[...],
                                  preferred_element_type=jnp.float32)   # residual 1
        x1_sc[...] = x1
        ln2_sc[...] = _layernorm(x1, g_ref[...], b_ref[...]).astype(jnp.bfloat16)
        acc_sc[...] = jnp.zeros_like(acc_sc)

    # Stream one (D, th) / (th, D) chunk of the MLP per grid step.
    h1 = jnp.dot(ln2_sc[...], wfc_ref[...], preferred_element_type=jnp.float32)
    h1 = jax.nn.gelu(h1, approximate=True)              # tanh GELU -> EUP slot
    acc_sc[...] += jnp.dot(h1.astype(jnp.bfloat16), wproj_ref[...],
                           preferred_element_type=jnp.float32)

    @pl.when(h == pl.num_programs(1) - 1)
    def _():
        o_ref[...] = (x1_sc[...] + acc_sc[...]).astype(o_ref.dtype)     # residual 2


def attn_out_mlp(attn2d, x2d, wo, g, b, wfc, wproj, *, tn, th):
    N, D = x2d.shape
    H4 = wfc.shape[1]
    return pl.pallas_call(
        attn_out_mlp_kernel,
        out_shape=jax.ShapeDtypeStruct((N, D), jnp.float32),
        grid_spec=pltpu.PrefetchScalarGridSpec(
            num_scalar_prefetch=0,
            grid=(N // tn, H4 // th),
            in_specs=[
                pl.BlockSpec((tn, D), lambda i, h: (i, 0)),   # attention context (bf16)
                pl.BlockSpec((tn, D), lambda i, h: (i, 0)),   # residual stream (f32)
                pl.BlockSpec((D, D), lambda i, h: (0, 0)),    # W_o
                pl.BlockSpec((1, D), lambda i, h: (0, 0)),
                pl.BlockSpec((1, D), lambda i, h: (0, 0)),
                pl.BlockSpec((D, th), lambda i, h: (0, h)),   # stream W_fc columns
                pl.BlockSpec((th, D), lambda i, h: (h, 0)),   # stream W_proj rows
            ],
            out_specs=pl.BlockSpec((tn, D), lambda i, h: (i, 0)),
            scratch_shapes=[
                pltpu.VMEM((tn, D), jnp.float32),     # x + attn @ W_o
                pltpu.VMEM((tn, D), jnp.bfloat16),    # LN2 activations
                pltpu.VMEM((tn, D), jnp.float32),     # MLP output accumulator
            ],
        ),
        input_output_aliases={1: 0},        # reuse the residual-stream HBM buffer
        compiler_params=pltpu.CompilerParams(
            dimension_semantics=("parallel", "arbitrary"),
            vmem_limit_bytes=_vmem_limit(
                [((tn, D), jnp.bfloat16), ((tn, D), jnp.float32), ((D, D), jnp.bfloat16),
                 ((1, D), jnp.float32), ((1, D), jnp.float32),
                 ((D, th), jnp.bfloat16), ((th, D), jnp.bfloat16),
                 ((tn, th), jnp.float32), ((tn, D), jnp.float32)],
                [((tn, D), jnp.float32), ((tn, D), jnp.bfloat16), ((tn, D), jnp.float32)])),
        cost_estimate=pl.CostEstimate(
            flops=2 * N * D * D + 4 * N * D * H4, transcendentals=N * H4,
            bytes_accessed=10 * N * D + 2 * (D * D + 2 * D * H4)),
    )(attn2d, x2d, wo, g, b, wfc, wproj)


# ----------------------------------------------------------------------------
# kernel 4: final LN + vocab head   (vocab-tiled, LN hoisted out of the j loop)
# ----------------------------------------------------------------------------
def ln_head_kernel(x_ref, g_ref, b_ref, w_ref, o_ref, xn_sc):
    @pl.when(pl.program_id(0) == 0)
    def _():
        xn_sc[...] = _layernorm(x_ref[...], g_ref[...], b_ref[...]).astype(jnp.bfloat16)

    o_ref[...] = jnp.dot(xn_sc[...], w_ref[...],
                         preferred_element_type=jnp.float32).astype(o_ref.dtype)


def ln_head(x_last, g, b, w_head, *, tv):
    B, D = x_last.shape
    V = w_head.shape[1]
    return pl.pallas_call(
        ln_head_kernel,
        out_shape=jax.ShapeDtypeStruct((B, V), jnp.float32),
        grid_spec=pltpu.PrefetchScalarGridSpec(
            num_scalar_prefetch=0,
            grid=(V // tv,),
            in_specs=[
                pl.BlockSpec((B, D), lambda j: (0, 0)),
                pl.BlockSpec((1, D), lambda j: (0, 0)),
                pl.BlockSpec((1, D), lambda j: (0, 0)),
                pl.BlockSpec((D, tv), lambda j: (0, j)),      # stream the vocab tiles
            ],
            out_specs=pl.BlockSpec((B, tv), lambda j: (0, j)),
            scratch_shapes=[pltpu.VMEM((B, D), jnp.bfloat16)],
        ),
        compiler_params=pltpu.CompilerParams(
            dimension_semantics=("arbitrary",),     # LN scratch is carried across j
            vmem_limit_bytes=_vmem_limit(
                [((B, D), jnp.float32), ((1, D), jnp.float32), ((1, D), jnp.float32),
                 ((D, tv), jnp.bfloat16), ((B, tv), jnp.float32)],
                [((B, D), jnp.bfloat16)])),
        cost_estimate=pl.CostEstimate(
            flops=2 * B * D * V, transcendentals=0,
            bytes_accessed=4 * B * D + 2 * D * V + 4 * B * V),
    )(x_last, g, b, w_head)


# ----------------------------------------------------------------------------
# full forward (Transformer.forward(idx, targets=None) -> (logits, None))
# ----------------------------------------------------------------------------
def transformer_forward(idx, params, num_heads):
    B, T = idx.shape
    D = params['wte'].shape[1]
    Dh = D // num_heads
    N = B * T

    tok_emb = jnp.take(params['wte'], idx, axis=0)           # (B, T, D) f32
    pos_emb = params['wpe'][:T][None, :, :]                  # (1, T, D)
    x = (tok_emb + pos_emb).reshape(N, D)                    # dropout = identity (eval)

    big_vmem = _VMEM_CAP_BYTES >= 96 * 2**20                 # v5e/v6e: 128 MiB, v7x: 64 MiB
    tn = _pick_tile(N, 512 if big_vmem else 256, mult=16)    # row tile
    tq = _pick_tile(T, 128, mult=16)                         # attention q / kv tile
    tk = tq
    tc = _pick_tile(3 * D, 1024, mult=128)                   # qkv output-column tile
    th = _pick_tile(4 * D, 1024, mult=128)                   # MLP hidden tile

    # Static lower-triangular (qi, ki) tile-pair list for causal attention: grid steps
    # (and K/V DMA) for tiles above the diagonal are never issued.
    nq = T // tq
    qi_idx = jnp.asarray(np.concatenate([np.full(i + 1, i, np.int32) for i in range(nq)]))
    ki_idx = jnp.asarray(np.concatenate([np.arange(i + 1, dtype=np.int32) for i in range(nq)]))

    for lp in params['blocks']:
        qkv = ln_qkv(x, lp['ln1_g'], lp['ln1_b'], lp['w_qkv'], tn=tn, tc=tc)  # (N, 3D) bf16
        # TODO(synk): for Dh >= 128 these head transposes can be folded into the
        # attention index_maps; at Dh < 128 per-head lane blocks violate the (8,128) rule.
        qkv = qkv.reshape(B, T, 3, num_heads, Dh)
        q = qkv[:, :, 0].transpose(0, 2, 1, 3).reshape(B * num_heads, T, Dh)
        k = qkv[:, :, 1].transpose(0, 2, 1, 3).reshape(B * num_heads, T, Dh)
        v = qkv[:, :, 2].transpose(0, 2, 1, 3).reshape(B * num_heads, T, Dh)
        ctx = flash_attention(q, k, v, qi_idx, ki_idx, tq=tq, tk=tk)          # (BH, T, Dh)
        ctx = ctx.reshape(B, num_heads, T, Dh).transpose(0, 2, 1, 3).reshape(N, D)
        x = attn_out_mlp(ctx, x, lp['w_o'], lp['ln2_g'], lp['ln2_b'],
                         lp['w_fc'], lp['w_proj'], tn=tn, th=th)              # (N, D) f32

    x_last = x.reshape(B, T, D)[:, -1, :]                    # LN is per-token -> commutes
    tv = _pick_tile(params['head_w'].shape[1], 1024, mult=128)
    logits = ln_head(x_last, params['ln_f_g'], params['ln_f_b'],
                     params['head_w'], tv=tv)
    return logits[:, None, :], None                          # (B, 1, vocab), loss=None


transformer_forward_jit = jax.jit(transformer_forward, static_argnums=(2,))


# ----------------------------------------------------------------------------
# deterministic parameter init (bf16 weights, f32 LN affine / embeddings)
# ----------------------------------------------------------------------------
def init_params(key, d_model, num_heads, max_length, vocab_size, layers):
    dh = d_model // num_heads
    q_scale = 1.0 / math.sqrt(dh)

    def nrm(k, shape):
        return 0.02 * jax.random.normal(k, shape, dtype=jnp.float32)

    keys = jax.random.split(key, 3 + layers)
    params = {
        'wte': nrm(keys[0], (vocab_size, d_model)),
        'wpe': nrm(keys[1], (max_length, d_model)),
        'ln_f_g': jnp.ones((1, d_model), jnp.float32),
        'ln_f_b': jnp.zeros((1, d_model), jnp.float32),
        'head_w': nrm(keys[2], (d_model, vocab_size)).astype(jnp.bfloat16),
        'blocks': [],
    }
    for li in range(layers):
        lk = jax.random.split(keys[3 + li], 4)
        w_qkv = nrm(lk[0], (d_model, 3 * d_model))
        # Fold the 1/sqrt(Dh) attention scale into the Q columns so the flash kernel
        # consumes q as-is (no per-kv-tile rescale / f32<->bf16 round trip).
        w_qkv = w_qkv.at[:, :d_model].multiply(q_scale)
        params['blocks'].append({
            'w_qkv': w_qkv.astype(jnp.bfloat16),
            'w_o':   nrm(lk[1], (d_model, d_model)).astype(jnp.bfloat16),
            'w_fc':  nrm(lk[2], (d_model, 4 * d_model)).astype(jnp.bfloat16),
            'w_proj': nrm(lk[3], (4 * d_model, d_model)).astype(jnp.bfloat16),
            'ln1_g': jnp.ones((1, d_model), jnp.float32),
            'ln1_b': jnp.zeros((1, d_model), jnp.float32),
            'ln2_g': jnp.ones((1, d_model), jnp.float32),
            'ln2_b': jnp.zeros((1, d_model), jnp.float32),
        })
    return params


# ----------------------------------------------------------------------------
if __name__ == "__main__":
    d_model, num_heads, max_length, vocab_size, layers = 32, 4, 16, 64, 2
    B, T = 2, 8

    key = jax.random.PRNGKey(0)
    pkey, ikey = jax.random.split(key)
    params = init_params(pkey, d_model, num_heads, max_length, vocab_size, layers)
    idx = jax.random.randint(ikey, (B, T), 0, vocab_size, dtype=jnp.int32)

    logits, loss = transformer_forward_jit(idx, params, num_heads)
    logits = jax.block_until_ready(logits)
    assert logits.shape == (B, 1, vocab_size)
    assert loss is None
    assert bool(jnp.all(jnp.isfinite(logits)))
    print("KERNEL_OK")
</pallas_src>

<mosaic_0001>
module attributes {stable_mosaic.version = 11 : i64} {
  func.func @flash_attn_kernel(%arg0: i32, %arg1: i32, %arg2: memref<1xi32, #tpu.memory_space<smem>>, %arg3: memref<1xi32, #tpu.memory_space<smem>>, %arg4: memref<1x8x8xbf16, #tpu.memory_space<vmem>>, %arg5: memref<1x8x8xbf16, #tpu.memory_space<vmem>>, %arg6: memref<1x8x8xbf16, #tpu.memory_space<vmem>>, %arg7: memref<1x8x8xbf16, #tpu.memory_space<vmem>>, %arg8: memref<8x1xf32, #tpu.memory_space<vmem>>, %arg9: memref<8x1xf32, #tpu.memory_space<vmem>>, %arg10: memref<8x8xf32, #tpu.memory_space<vmem>>) attributes {dimension_semantics = [#tpu.dimension_semantics<parallel>, #tpu.dimension_semantics<arbitrary>], iteration_bounds = array<i64: 8, 1>, scalar_prefetch = 2 : i64, scratch_operands = 3 : i64, tpu.core_type = #tpu.core_type<tc>, window_params = [{transform_indices = @transform_0, window_bounds = array<i64: 1, 8, 8>}, {transform_indices = @transform_1, window_bounds = array<i64: 1, 8, 8>}, {transform_indices = @transform_2, window_bounds = array<i64: 1, 8, 8>}, {transform_indices = @transform_3, window_bounds = array<i64: 1, 8, 8>}]} {
    %0 = arith.index_cast %arg1 : i32 to index
    %1 = memref.load %arg2[%0] : memref<1xi32, #tpu.memory_space<smem>>
    %2 = arith.index_cast %arg1 : i32 to index
    %3 = memref.load %arg3[%2] : memref<1xi32, #tpu.memory_space<smem>>
    %c0_i32 = arith.constant 0 : i32
    %4 = arith.cmpi eq, %3, %c0_i32 : i32
    %5 = arith.extui %4 : i1 to i32
    %c0_i32_0 = arith.constant 0 : i32
    %6 = arith.cmpi ne, %5, %c0_i32_0 : i32
    scf.if %6 {
      %cst_8 = arith.constant -1.000000e+30 : f32
      %18 = vector.broadcast %cst_8 : f32 to vector<8x1xf32>
      %c0_9 = arith.constant 0 : index
      %c0_10 = arith.constant 0 : index
      %19 = vector.load %arg8[%c0_9, %c0_10] : memref<8x1xf32, #tpu.memory_space<vmem>>, vector<8x1xf32>
      tpu.vector_store %arg8[%c0_9, %c0_10], %18 {strides = array<i32>} : memref<8x1xf32, #tpu.memory_space<vmem>>, vector<8x1xf32>,
      %cst_11 = arith.constant 0.000000e+00 : f32
      %20 = vector.broadcast %cst_11 : f32 to vector<8x1xf32>
      %c0_12 = arith.constant 0 : index
      %c0_13 = arith.constant 0 : index
      %21 = vector.load %arg9[%c0_12, %c0_13] : memref<8x1xf32, #tpu.memory_space<vmem>>, vector<8x1xf32>
      tpu.vector_store %arg9[%c0_12, %c0_13], %20 {strides = array<i32>} : memref<8x1xf32, #tpu.memory_space<vmem>>, vector<8x1xf32>,
      %cst_14 = arith.constant 0.000000e+00 : f32
      %22 = vector.broadcast %cst_14 : f32 to vector<8x8xf32>
      %c0_15 = arith.constant 0 : index
      %c0_16 = arith.constant 0 : index
      %23 = vector.load %arg10[%c0_15, %c0_16] : memref<8x8xf32, #tpu.memory_space<vmem>>, vector<8x8xf32>
      tpu.vector_store %arg10[%c0_15, %c0_16], %22 {strides = array<i32>} : memref<8x8xf32, #tpu.memory_space<vmem>>, vector<8x8xf32>,
    } else {
    }
    %c0 = arith.constant 0 : index
    %c0_1 = arith.constant 0 : index
    %c0_2 = arith.constant 0 : index
    %7 = vector.load %arg4[%c0, %c0_1, %c0_2] : memref<1x8x8xbf16, #tpu.memory_space<vmem>>, vector<1x8x8xbf16>
    %8 = vector.shape_cast %7 : vector<1x8x8xbf16> to vector<8x8xbf16>
    %c0_3 = arith.constant 0 : index
    %c0_4 = arith.constant 0 : index
    %c0_5 = arith.constant 0 : index
    %9 = vector.load %arg5[%c0_3, %c0_4, %c0_5] : memref<1x8x8xbf16, #tpu.memory_space<vmem>>, vector<1x8x8xbf16>
    %10 = vector.shape_cast %9 : vector<1x8x8xbf16> to vector<8x8xbf16>
    %cst = arith.constant dense<0.000000e+00> : vector<8x8xf32>
    %11 = tpu.matmul %8, %10, %cst {dimension_numbers = #tpu.dot_dimension_numbers<[1], [1], [0], [0], [0, 0, 1, 0], [], []>} : vector<8x8xbf16>, vector<8x8xbf16>, vector<8x8xf32> -> vector<8x8xf32>
    %12 = arith.cmpi slt, %3, %1 : i32
    %13 = arith.extui %12 : i1 to i32
    %c0_i32_6 = arith.constant 0 : i32
    %14 = arith.cmpi ne, %13, %c0_i32_6 : i32
    scf.if %14 {
      %c0_8 = arith.constant 0 : index
      %c0_9 = arith.constant 0 : index
      %18 = vector.load %arg8[%c0_8, %c0_9] : memref<8x1xf32, #tpu.memory_space<vmem>>, vector<8x1xf32>
      %cst_10 = arith.constant dense<0xFF800000> : vector<8xf32>
      %19 = vector.multi_reduction <maximumf>, %11, %cst_10 [1] : vector<8x8xf32> to vector<8xf32>
      %20 = vector.shape_cast %19 : vector<8xf32> to vector<8x1xf32>
      %21 = arith.maximumf %18, %20 : vector<8x1xf32>
      %22 = arith.subf %18, %21 : vector<8x1xf32>
      %23 = math.exp %22 : vector<8x1xf32>
      %24 = vector.broadcast %21 : vector<8x1xf32> to vector<8x8xf32>
      %25 = arith.subf %11, %24 : vector<8x8xf32>
      %26 = math.exp %25 : vector<8x8xf32>
      %c0_11 = arith.constant 0 : index
      %c0_12 = arith.constant 0 : index
      %27 = vector.load %arg9[%c0_11, %c0_12] : memref<8x1xf32, #tpu.memory_space<vmem>>, vector<8x1xf32>
      %28 = arith.mulf %23, %27 : vector<8x1xf32>
      %cst_13 = arith.constant dense<0.000000e+00> : vector<8xf32>
      %29 = vector.multi_reduction <add>, %26, %cst_13 [1] : vector<8x8xf32> to vector<8xf32>
      %30 = vector.shape_cast %29 : vector<8xf32> to vector<8x1xf32>
      %31 = arith.addf %28, %30 : vector<8x1xf32>
      %c0_14 = arith.constant 0 : index
      %c0_15 = arith.constant 0 : index
      %32 = vector.load %arg9[%c0_14, %c0_15] : memref<8x1xf32, #tpu.memory_space<vmem>>, vector<8x1xf32>
      tpu.vector_store %arg9[%c0_14, %c0_15], %31 {strides = array<i32>} : memref<8x1xf32, #tpu.memory_space<vmem>>, vector<8x1xf32>,
      %c0_16 = arith.constant 0 : index
      %c0_17 = arith.constant 0 : index
      %33 = vector.load %arg10[%c0_16, %c0_17] : memref<8x8xf32, #tpu.memory_space<vmem>>, vector<8x8xf32>
      %34 = vector.broadcast %23 : vector<8x1xf32> to vector<8x8xf32>
      %35 = arith.mulf %34, %33 : vector<8x8xf32>
      %36 = arith.truncf %26 : vector<8x8xf32> to vector<8x8xbf16>
      %c0_18 = arith.constant 0 : index
      %c0_19 = arith.constant 0 : index
      %c0_20 = arith.constant 0 : index
      %37 = vector.load %arg6[%c0_18, %c0_19, %c0_20] : memref<1x8x8xbf16, #tpu.memory_space<vmem>>, vector<1x8x8xbf16>
      %38 = vector.shape_cast %37 : vector<1x8x8xbf16> to vector<8x8xbf16>
      %cst_21 = arith.constant dense<0.000000e+00> : vector<8x8xf32>
      %39 = tpu.matmul %36, %38, %cst_21 {dimension_numbers = #tpu.dot_dimension_numbers<[1], [0], [0], [1], [0, 0, 1, 1], [], []>} : vector<8x8xbf16>, vector<8x8xbf16>, vector<8x8xf32> -> vector<8x8xf32>
      %40 = arith.addf %35, %39 : vector<8x8xf32>
      %c0_22 = arith.constant 0 : index
      %c0_23 = arith.constant 0 : index
      %41 = vector.load %arg10[%c0_22, %c0_23] : memref<8x8xf32, #tpu.memory_space<vmem>>, vector<8x8xf32>
      tpu.vector_store %arg10[%c0_22, %c0_23], %40 {strides = array<i32>} : memref<8x8xf32, #tpu.memory_space<vmem>>, vector<8x8xf32>,
      %c0_24 = arith.constant 0 : index
      %c0_25 = arith.constant 0 : index
      %42 = vector.load %arg8[%c0_24, %c0_25] : memref<8x1xf32, #tpu.memory_space<vmem>>, vector<8x1xf32>
      tpu.vector_store %arg8[%c0_24, %c0_25], %21 {strides = array<i32>} : memref<8x1xf32, #tpu.memory_space<vmem>>, vector<8x1xf32>,
    } else {
    }
    %15 = arith.cmpi eq, %3, %1 : i32
    %16 = arith.extui %15 : i1 to i32
    %c0_i32_7 = arith.constant 0 : i32
    %17 = arith.cmpi ne, %16, %c0_i32_7 : i32
    scf.if %17 {
      %18 = tpu.iota {dimensions = array<i32: 0>} : vector<8x8xi32>
      %19 = tpu.iota {dimensions = array<i32: 1>} : vector<8x8xi32>
      %20 = arith.cmpi sle, %19, %18 : vector<8x8xi32>
      %cst_8 = arith.constant -1.000000e+30 : f32
      %21 = vector.broadcast %cst_8 : f32 to vector<8x8xf32>
      %22 = arith.select %20, %11, %21 : vector<8x8xi1>, vector<8x8xf32>
      %c0_9 = arith.constant 0 : index
      %c0_10 = arith.constant 0 : index
      %23 = vector.load %arg8[%c0_9, %c0_10] : memref<8x1xf32, #tpu.memory_space<vmem>>, vector<8x1xf32>
      %cst_11 = arith.constant dense<0xFF800000> : vector<8xf32>
      %24 = vector.multi_reduction <maximumf>, %22, %cst_11 [1] : vector<8x8xf32> to vector<8xf32>
      %25 = vector.shape_cast %24 : vector<8xf32> to vector<8x1xf32>
      %26 = arith.maximumf %23, %25 : vector<8x1xf32>
      %27 = arith.subf %23, %26 : vector<8x1xf32>
      %28 = math.exp %27 : vector<8x1xf32>
      %29 = vector.broadcast %26 : vector<8x1xf32> to vector<8x8xf32>
      %30 = arith.subf %22, %29 : vector<8x8xf32>
      %31 = math.exp %30 : vector<8x8xf32>
      %c0_12 = arith.constant 0 : index
      %c0_13 = arith.constant 0 : index
      %32 = vector.load %arg9[%c0_12, %c0_13] : memref<8x1xf32, #tpu.memory_space<vmem>>, vector<8x1xf32>
      %33 = arith.mulf %28, %32 : vector<8x1xf32>
      %cst_14 = arith.constant dense<0.000000e+00> : vector<8xf32>
      %34 = vector.multi_reduction <add>, %31, %cst_14 [1] : vector<8x8xf32> to vector<8xf32>
      %35 = vector.shape_cast %34 : vector<8xf32> to vector<8x1xf32>
      %36 = arith.addf %33, %35 : vector<8x1xf32>
      %c0_15 = arith.constant 0 : index
      %c0_16 = arith.constant 0 : index
      %37 = vector.load %arg9[%c0_15, %c0_16] : memref<8x1xf32, #tpu.memory_space<vmem>>, vector<8x1xf32>
      tpu.vector_store %arg9[%c0_15, %c0_16], %36 {strides = array<i32>} : memref<8x1xf32, #tpu.memory_space<vmem>>, vector<8x1xf32>,
      %c0_17 = arith.constant 0 : index
      %c0_18 = arith.constant 0 : index
      %38 = vector.load %arg10[%c0_17, %c0_18] : memref<8x8xf32, #tpu.memory_space<vmem>>, vector<8x8xf32>
      %39 = vector.broadcast %28 : vector<8x1xf32> to vector<8x8xf32>
      %40 = arith.mulf %39, %38 : vector<8x8xf32>
      %41 = arith.truncf %31 : vector<8x8xf32> to vector<8x8xbf16>
      %c0_19 = arith.constant 0 : index
      %c0_20 = arith.constant 0 : index
      %c0_21 = arith.constant 0 : index
      %42 = vector.load %arg6[%c0_19, %c0_20, %c0_21] : memref<1x8x8xbf16, #tpu.memory_space<vmem>>, vector<1x8x8xbf16>
      %43 = vector.shape_cast %42 : vector<1x8x8xbf16> to vector<8x8xbf16>
      %cst_22 = arith.constant dense<0.000000e+00> : vector<8x8xf32>
      %44 = tpu.matmul %41, %43, %cst_22 {dimension_numbers = #tpu.dot_dimension_numbers<[1], [0], [0], [1], [0, 0, 1, 1], [], []>} : vector<8x8xbf16>, vector<8x8xbf16>, vector<8x8xf32> -> vector<8x8xf32>
      %45 = arith.addf %40, %44 : vector<8x8xf32>
      %c0_23 = arith.constant 0 : index
      %c0_24 = arith.constant 0 : index
      %46 = vector.load %arg10[%c0_23, %c0_24] : memref<8x8xf32, #tpu.memory_space<vmem>>, vector<8x8xf32>
      tpu.vector_store %arg10[%c0_23, %c0_24], %45 {strides = array<i32>} : memref<8x8xf32, #tpu.memory_space<vmem>>, vector<8x8xf32>,
      %c0_25 = arith.constant 0 : index
      %c0_26 = arith.constant 0 : index
      %47 = vector.load %arg8[%c0_25, %c0_26] : memref<8x1xf32, #tpu.memory_space<vmem>>, vector<8x1xf32>
      tpu.vector_store %arg8[%c0_25, %c0_26], %26 {strides = array<i32>} : memref<8x1xf32, #tpu.memory_space<vmem>>, vector<8x1xf32>,
      %c0_27 = arith.constant 0 : index
      %c0_28 = arith.constant 0 : index
      %48 = vector.load %arg9[%c0_27, %c0_28] : memref<8x1xf32, #tpu.memory_space<vmem>>, vector<8x1xf32>
      %49 = tpu.reciprocal %48 {approx = true} : vector<8x1xf32> -> vector<8x1xf32>
      %c0_29 = arith.constant 0 : index
      %c0_30 = arith.constant 0 : index
      %50 = vector.load %arg10[%c0_29, %c0_30] : memref<8x8xf32, #tpu.memory_space<vmem>>, vector<8x8xf32>
      %51 = vector.broadcast %49 : vector<8x1xf32> to vector<8x8xf32>
      %52 = arith.mulf %50, %51 : vector<8x8xf32>
      %53 = arith.truncf %52 : vector<8x8xf32> to vector<8x8xbf16>
      %c0_31 = arith.constant 0 : index
      %c0_32 = arith.constant 0 : index
      %c0_33 = arith.constant 0 : index
      %54 = vector.load %arg7[%c0_31, %c0_32, %c0_33] : memref<1x8x8xbf16, #tpu.memory_space<vmem>>, vector<1x8x8xbf16>
      %55 = vector.shape_cast %54 : vector<1x8x8xbf16> to vector<8x8xbf16>
      %56 = vector.shape_cast %53 : vector<8x8xbf16> to vector<1x8x8xbf16>
      tpu.vector_store %arg7[%c0_31, %c0_32, %c0_33], %56 {strides = array<i32>} : memref<1x8x8xbf16, #tpu.memory_space<vmem>>, vector<1x8x8xbf16>,
    } else {
    }
    return
  }
  func.func @transform_0(%arg0: i32, %arg1: i32, %arg2: memref<1xi32, #tpu.memory_space<smem>>, %arg3: memref<1xi32, #tpu.memory_space<smem>>) -> (i32, i32, i32) {
    %0 = arith.index_cast %arg1 : i32 to index
    %1 = memref.load %arg2[%0] : memref<1xi32, #tpu.memory_space<smem>>
    %c0_i32 = arith.constant 0 : i32
    %c0_i32_0 = arith.constant 0 : i32
    return %arg0, %1, %c0_i32 : i32, i32, i32
  }
  func.func @transform_1(%arg0: i32, %arg1: i32, %arg2: memref<1xi32, #tpu.memory_space<smem>>, %arg3: memref<1xi32, #tpu.memory_space<smem>>) -> (i32, i32, i32) {
    %0 = arith.index_cast %arg1 : i32 to index
    %1 = memref.load %arg3[%0] : memref<1xi32, #tpu.memory_space<smem>>
    %c0_i32 = arith.constant 0 : i32
    %c0_i32_0 = arith.constant 0 : i32
    return %arg0, %1, %c0_i32 : i32, i32, i32
  }
  func.func @transform_2(%arg0: i32, %arg1: i32, %arg2: memref<1xi32, #tpu.memory_space<smem>>, %arg3: memref<1xi32, #tpu.memory_space<smem>>) -> (i32, i32, i32) {
    %0 = arith.index_cast %arg1 : i32 to index
    %1 = memref.load %arg3[%0] : memref<1xi32, #tpu.memory_space<smem>>
    %c0_i32 = arith.constant 0 : i32
    %c0_i32_0 = arith.constant 0 : i32
    return %arg0, %1, %c0_i32 : i32, i32, i32
  }
  func.func @transform_3(%arg0: i32, %arg1: i32, %arg2: memref<1xi32, #tpu.memory_space<smem>>, %arg3: memref<1xi32, #tpu.memory_space<smem>>) -> (i32, i32, i32) {
    %0 = arith.index_cast %arg1 : i32 to index
    %1 = memref.load %arg2[%0] : memref<1xi32, #tpu.memory_space<smem>>
    %c0_i32 = arith.constant 0 : i32
    %c0_i32_0 = arith.constant 0 : i32
    return %arg0, %1, %c0_i32 : i32, i32, i32
  }
}

module attributes {stable_mosaic.version = 11 : i64} {
  func.func @ln_qkv_kernel(%arg0: i32, %arg1: i32, %arg2: memref<16x32xf32, #tpu.memory_space<vmem>>, %arg3: memref<1x32xf32, #tpu.memory_space<vmem>>, %arg4: memref<1x32xf32, #tpu.memory_space<vmem>>, %arg5: memref<32x96xbf16, #tpu.memory_space<vmem>>, %arg6: memref<16x96xbf16, #tpu.memory_space<vmem>>, %arg7: memref<16x32xbf16, #tpu.memory_space<vmem>>) attributes {dimension_semantics = [#tpu.dimension_semantics<parallel>, #tpu.dimension_semantics<arbitrary>], iteration_bounds = array<i64: 1, 1>, scalar_prefetch = 0 : i64, scratch_operands = 1 : i64, tpu.core_type = #tpu.core_type<tc>, window_params = [{transform_indices = @transform_0, window_bounds = array<i64: 16, 32>}, {pipeline_mode = #tpu.pipeline_mode<synchronous>, transform_indices = @transform_1, window_bounds = array<i64: 1, 32>}, {pipeline_mode = #tpu.pipeline_mode<synchronous>, transform_indices = @transform_2, window_bounds = array<i64: 1, 32>}, {transform_indices = @transform_3, window_bounds = array<i64: 32, 96>}, {transform_indices = @transform_4, window_bounds = array<i64: 16, 96>}]} {
    %c0_i32 = arith.constant 0 : i32
    %0 = arith.cmpi eq, %arg1, %c0_i32 : i32
    %1 = arith.extui %0 : i1 to i32
    %c0_i32_0 = arith.constant 0 : i32
    %2 = arith.cmpi ne, %1, %c0_i32_0 : i32
    scf.if %2 {
      %c0_6 = arith.constant 0 : index
      %c0_7 = arith.constant 0 : index
      %8 = vector.load %arg2[%c0_6, %c0_7] : memref<16x32xf32, #tpu.memory_space<vmem>>, vector<16x32xf32>
      %c0_8 = arith.constant 0 : index
      %c0_9 = arith.constant 0 : index
      %9 = vector.load %arg3[%c0_8, %c0_9] : memref<1x32xf32, #tpu.memory_space<vmem>>, vector<1x32xf32>
      %c0_10 = arith.constant 0 : index
      %c0_11 = arith.constant 0 : index
      %10 = vector.load %arg4[%c0_10, %c0_11] : memref<1x32xf32, #tpu.memory_space<vmem>>, vector<1x32xf32>
      %cst_12 = arith.constant dense<0.000000e+00> : vector<16xf32>
      %11 = vector.multi_reduction <add>, %8, %cst_12 [1] : vector<16x32xf32> to vector<16xf32>
      %12 = vector.shape_cast %11 : vector<16xf32> to vector<16x1xf32>
      %cst_13 = arith.constant 3.200000e+01 : f32
      %13 = vector.broadcast %cst_13 : f32 to vector<16x1xf32>
      %14 = arith.divf %12, %13 : vector<16x1xf32>
      %15 = vector.broadcast %14 : vector<16x1xf32> to vector<16x32xf32>
      %16 = arith.subf %8, %15 : vector<16x32xf32>
      %17 = arith.mulf %16, %16 : vector<16x32xf32>
      %cst_14 = arith.constant dense<0.000000e+00> : vector<16xf32>
      %18 = vector.multi_reduction <add>, %17, %cst_14 [1] : vector<16x32xf32> to vector<16xf32>
      %19 = vector.shape_cast %18 : vector<16xf32> to vector<16x1xf32>
      %cst_15 = arith.constant 3.200000e+01 : f32
      %20 = vector.broadcast %cst_15 : f32 to vector<16x1xf32>
      %21 = arith.divf %19, %20 : vector<16x1xf32>
      %22 = vector.broadcast %14 : vector<16x1xf32> to vector<16x32xf32>
      %23 = arith.subf %8, %22 : vector<16x32xf32>
      %cst_16 = arith.constant 9.99999974E-6 : f32
      %24 = vector.broadcast %cst_16 : f32 to vector<16x1xf32>
      %25 = arith.addf %21, %24 : vector<16x1xf32>
      %26 = math.rsqrt %25 : vector<16x1xf32>
      %27 = vector.broadcast %26 : vector<16x1xf32> to vector<16x32xf32>
      %28 = arith.mulf %23, %27 : vector<16x32xf32>
      %29 = vector.broadcast %9 : vector<1x32xf32> to vector<16x32xf32>
      %30 = arith.mulf %28, %29 : vector<16x32xf32>
      %31 = vector.broadcast %10 : vector<1x32xf32> to vector<16x32xf32>
      %32 = arith.addf %30, %31 : vector<16x32xf32>
      %33 = arith.truncf %32 : vector<16x32xf32> to vector<16x32xbf16>
      %c0_17 = arith.constant 0 : index
      %c0_18 = arith.constant 0 : index
      %34 = vector.load %arg7[%c0_17, %c0_18] : memref<16x32xbf16, #tpu.memory_space<vmem>>, vector<16x32xbf16>
      tpu.vector_store %arg7[%c0_17, %c0_18], %33 {strides = array<i32>} : memref<16x32xbf16, #tpu.memory_space<vmem>>, vector<16x32xbf16>,
    } else {
    }
    %c0 = arith.constant 0 : index
    %c0_1 = arith.constant 0 : index
    %3 = vector.load %arg7[%c0, %c0_1] : memref<16x32xbf16, #tpu.memory_space<vmem>>, vector<16x32xbf16>
    %c0_2 = arith.constant 0 : index
    %c0_3 = arith.constant 0 : index
    %4 = vector.load %arg5[%c0_2, %c0_3] : memref<32x96xbf16, #tpu.memory_space<vmem>>, vector<32x96xbf16>
    %cst = arith.constant dense<0.000000e+00> : vector<16x96xf32>
    %5 = tpu.matmul %3, %4, %cst {dimension_numbers = #tpu.dot_dimension_numbers<[1], [0], [0], [1], [0, 0, 1, 1], [], []>} : vector<16x32xbf16>, vector<32x96xbf16>, vector<16x96xf32> -> vector<16x96xf32>
    %6 = arith.truncf %5 : vector<16x96xf32> to vector<16x96xbf16>
    %c0_4 = arith.constant 0 : index
    %c0_5 = arith.constant 0 : index
    %7 = vector.load %arg6[%c0_4, %c0_5] : memref<16x96xbf16, #tpu.memory_space<vmem>>, vector<16x96xbf16>
    tpu.vector_store %arg6[%c0_4, %c0_5], %6 {strides = array<i32>} : memref<16x96xbf16, #tpu.memory_space<vmem>>, vector<16x96xbf16>,
    return
  }
  func.func @transform_0(%arg0: i32, %arg1: i32) -> (i32, i32) {
    %c0_i32 = arith.constant 0 : i32
    %c0_i32_0 = arith.constant 0 : i32
    return %arg0, %c0_i32 : i32, i32
  }
  func.func @transform_1(%arg0: i32, %arg1: i32) -> (i32, i32) {
    %c0_i32 = arith.constant 0 : i32
    %c0_i32_0 = arith.constant 0 : i32
    %c0_i32_1 = arith.constant 0 : i32
    return %c0_i32, %c0_i32_0 : i32, i32
  }
  func.func @transform_2(%arg0: i32, %arg1: i32) -> (i32, i32) {
    %c0_i32 = arith.constant 0 : i32
    %c0_i32_0 = arith.constant 0 : i32
    %c0_i32_1 = arith.constant 0 : i32
    return %c0_i32, %c0_i32_0 : i32, i32
  }
  func.func @transform_3(%arg0: i32, %arg1: i32) -> (i32, i32) {
    %c0_i32 = arith.constant 0 : i32
    %c0_i32_0 = arith.constant 0 : i32
    return %c0_i32, %arg1 : i32, i32
  }
  func.func @transform_4(%arg0: i32, %arg1: i32) -> (i32, i32) {
    %c0_i32 = arith.constant 0 : i32
    return %arg0, %arg1 : i32, i32
  }
}

module attributes {stable_mosaic.version = 11 : i64} {
  func.func @attn_out_mlp_kernel(%arg0: i32, %arg1: i32, %arg2: memref<16x32xbf16, #tpu.memory_space<vmem>>, %arg3: memref<16x32xf32, #tpu.memory_space<vmem>>, %arg4: memref<32x32xbf16, #tpu.memory_space<vmem>>, %arg5: memref<1x32xf32, #tpu.memory_space<vmem>>, %arg6: memref<1x32xf32, #tpu.memory_space<vmem>>, %arg7: memref<32x128xbf16, #tpu.memory_space<vmem>>, %arg8: memref<128x32xbf16, #tpu.memory_space<vmem>>, %arg9: memref<16x32xf32, #tpu.memory_space<vmem>>, %arg10: memref<16x32xf32, #tpu.memory_space<vmem>>, %arg11: memref<16x32xbf16, #tpu.memory_space<vmem>>, %arg12: memref<16x32xf32, #tpu.memory_space<vmem>>) attributes {dimension_semantics = [#tpu.dimension_semantics<parallel>, #tpu.dimension_semantics<arbitrary>], iteration_bounds = array<i64: 1, 1>, scalar_prefetch = 0 : i64, scratch_operands = 3 : i64, tpu.core_type = #tpu.core_type<tc>, window_params = [{transform_indices = @transform_0, window_bounds = array<i64: 16, 32>}, {transform_indices = @transform_1, window_bounds = array<i64: 16, 32>}, {pipeline_mode = #tpu.pipeline_mode<synchronous>, transform_indices = @transform_2, window_bounds = array<i64: 32, 32>}, {pipeline_mode = #tpu.pipeline_mode<synchronous>, transform_indices = @transform_3, window_bounds = array<i64: 1, 32>}, {pipeline_mode = #tpu.pipeline_mode<synchronous>, transform_indices = @transform_4, window_bounds = array<i64: 1, 32>}, {transform_indices = @transform_5, window_bounds = array<i64: 32, 128>}, {transform_indices = @transform_6, window_bounds = array<i64: 128, 32>}, {transform_indices = @transform_7, window_bounds = array<i64: 16, 32>}]} {
    %c0_i32 = arith.constant 0 : i32
    %0 = arith.cmpi eq, %arg1, %c0_i32 : i32
    %1 = arith.extui %0 : i1 to i32
    %c0_i32_0 = arith.constant 0 : i32
    %2 = arith.cmpi ne, %1, %c0_i32_0 : i32
    scf.if %2 {
      %c0_17 = arith.constant 0 : index
      %c0_18 = arith.constant 0 : index
      %28 = vector.load %arg3[%c0_17, %c0_18] : memref<16x32xf32, #tpu.memory_space<vmem>>, vector<16x32xf32>
      %c0_19 = arith.constant 0 : index
      %c0_20 = arith.constant 0 : index
      %29 = vector.load %arg2[%c0_19, %c0_20] : memref<16x32xbf16, #tpu.memory_space<vmem>>, vector<16x32xbf16>
      %c0_21 = arith.constant 0 : index
      %c0_22 = arith.constant 0 : index
      %30 = vector.load %arg4[%c0_21, %c0_22] : memref<32x32xbf16, #tpu.memory_space<vmem>>, vector<32x32xbf16>
      %cst_23 = arith.constant dense<0.000000e+00> : vector<16x32xf32>
      %31 = tpu.matmul %29, %30, %cst_23 {dimension_numbers = #tpu.dot_dimension_numbers<[1], [0], [0], [1], [0, 0, 1, 1], [], []>} : vector<16x32xbf16>, vector<32x32xbf16>, vector<16x32xf32> -> vector<16x32xf32>
      %32 = arith.addf %28, %31 : vector<16x32xf32>
      %c0_24 = arith.constant 0 : index
      %c0_25 = arith.constant 0 : index
      %33 = vector.load %arg10[%c0_24, %c0_25] : memref<16x32xf32, #tpu.memory_space<vmem>>, vector<16x32xf32>
      tpu.vector_store %arg10[%c0_24, %c0_25], %32 {strides = array<i32>} : memref<16x32xf32, #tpu.memory_space<vmem>>, vector<16x32xf32>,
      %c0_26 = arith.constant 0 : index
      %c0_27 = arith.constant 0 : index
      %34 = vector.load %arg5[%c0_26, %c0_27] : memref<1x32xf32, #tpu.memory_space<vmem>>, vector<1x32xf32>
      %c0_28 = arith.constant 0 : index
      %c0_29 = arith.constant 0 : index
      %35 = vector.load %arg6[%c0_28, %c0_29] : memref<1x32xf32, #tpu.memory_space<vmem>>, vector<1x32xf32>
      %cst_30 = arith.constant dense<0.000000e+00> : vector<16xf32>
      %36 = vector.multi_reduction <add>, %32, %cst_30 [1] : vector<16x32xf32> to vector<16xf32>
      %37 = vector.shape_cast %36 : vector<16xf32> to vector<16x1xf32>
      %cst_31 = arith.constant 3.200000e+01 : f32
      %38 = vector.broadcast %cst_31 : f32 to vector<16x1xf32>
      %39 = arith.divf %37, %38 : vector<16x1xf32>
      %40 = vector.broadcast %39 : vector<16x1xf32> to vector<16x32xf32>
      %41 = arith.subf %32, %40 : vector<16x32xf32>
      %42 = arith.mulf %41, %41 : vector<16x32xf32>
      %cst_32 = arith.constant dense<0.000000e+00> : vector<16xf32>
      %43 = vector.multi_reduction <add>, %42, %cst_32 [1] : vector<16x32xf32> to vector<16xf32>
      %44 = vector.shape_cast %43 : vector<16xf32> to vector<16x1xf32>
      %cst_33 = arith.constant 3.200000e+01 : f32
      %45 = vector.broadcast %cst_33 : f32 to vector<16x1xf32>
      %46 = arith.divf %44, %45 : vector<16x1xf32>
      %47 = vector.broadcast %39 : vector<16x1xf32> to vector<16x32xf32>
      %48 = arith.subf %32, %47 : vector<16x32xf32>
      %cst_34 = arith.constant 9.99999974E-6 : f32
      %49 = vector.broadcast %cst_34 : f32 to vector<16x1xf32>
      %50 = arith.addf %46, %49 : vector<16x1xf32>
      %51 = math.rsqrt %50 : vector<16x1xf32>
      %52 = vector.broadcast %51 : vector<16x1xf32> to vector<16x32xf32>
      %53 = arith.mulf %48, %52 : vector<16x32xf32>
      %54 = vector.broadcast %34 : vector<1x32xf32> to vector<16x32xf32>
      %55 = arith.mulf %53, %54 : vector<16x32xf32>
      %56 = vector.broadcast %35 : vector<1x32xf32> to vector<16x32xf32>
      %57 = arith.addf %55, %56 : vector<16x32xf32>
      %58 = arith.truncf %57 : vector<16x32xf32> to vector<16x32xbf16>
      %c0_35 = arith.constant 0 : index
      %c0_36 = arith.constant 0 : index
      %59 = vector.load %arg11[%c0_35, %c0_36] : memref<16x32xbf16, #tpu.memory_space<vmem>>, vector<16x32xbf16>
      tpu.vector_store %arg11[%c0_35, %c0_36], %58 {strides = array<i32>} : memref<16x32xbf16, #tpu.memory_space<vmem>>, vector<16x32xbf16>,
      %cst_37 = arith.constant 0.000000e+00 : f32
      %60 = vector.broadcast %cst_37 : f32 to vector<16x32xf32>
      %c0_38 = arith.constant 0 : index
      %c0_39 = arith.constant 0 : index
      %61 = vector.load %arg12[%c0_38, %c0_39] : memref<16x32xf32, #tpu.memory_space<vmem>>, vector<16x32xf32>
      tpu.vector_store %arg12[%c0_38, %c0_39], %60 {strides = array<i32>} : memref<16x32xf32, #tpu.memory_space<vmem>>, vector<16x32xf32>,
    } else {
    }
    %c0 = arith.constant 0 : index
    %c0_1 = arith.constant 0 : index
    %3 = vector.load %arg11[%c0, %c0_1] : memref<16x32xbf16, #tpu.memory_space<vmem>>, vector<16x32xbf16>
    %c0_2 = arith.constant 0 : index
    %c0_3 = arith.constant 0 : index
    %4 = vector.load %arg7[%c0_2, %c0_3] : memref<32x128xbf16, #tpu.memory_space<vmem>>, vector<32x128xbf16>
    %cst = arith.constant dense<0.000000e+00> : vector<16x128xf32>
    %5 = tpu.matmul %3, %4, %cst {dimension_numbers = #tpu.dot_dimension_numbers<[1], [0], [0], [1], [0, 0, 1, 1], [], []>} : vector<16x32xbf16>, vector<32x128xbf16>, vector<16x128xf32> -> vector<16x128xf32>
    %6 = arith.mulf %5, %5 : vector<16x128xf32>
    %7 = arith.mulf %5, %6 : vector<16x128xf32>
    %cst_4 = arith.constant 4.471500e-02 : f32
    %8 = vector.broadcast %cst_4 : f32 to vector<16x128xf32>
    %9 = arith.mulf %8, %7 : vector<16x128xf32>
    %10 = arith.addf %5, %9 : vector<16x128xf32>
    %cst_5 = arith.constant 0.797884583 : f32
    %11 = vector.broadcast %cst_5 : f32 to vector<16x128xf32>
    %12 = arith.mulf %11, %10 : vector<16x128xf32>
    %13 = math.tanh %12 : vector<16x128xf32>
    %cst_6 = arith.constant 1.000000e+00 : f32
    %14 = vector.broadcast %cst_6 : f32 to vector<16x128xf32>
    %15 = arith.addf %14, %13 : vector<16x128xf32>
    %cst_7 = arith.constant 5.000000e-01 : f32
    %16 = vector.broadcast %cst_7 : f32 to vector<16x128xf32>
    %17 = arith.mulf %16, %15 : vector<16x128xf32>
    %18 = arith.mulf %5, %17 : vector<16x128xf32>
    %c0_8 = arith.constant 0 : index
    %c0_9 = arith.constant 0 : index
    %19 = vector.load %arg12[%c0_8, %c0_9] : memref<16x32xf32, #tpu.memory_space<vmem>>, vector<16x32xf32>
    %20 = arith.truncf %18 : vector<16x128xf32> to vector<16x128xbf16>
    %c0_10 = arith.constant 0 : index
    %c0_11 = arith.constant 0 : index
    %21 = vector.load %arg8[%c0_10, %c0_11] : memref<128x32xbf16, #tpu.memory_space<vmem>>, vector<128x32xbf16>
    %cst_12 = arith.constant dense<0.000000e+00> : vector<16x32xf32>
    %22 = tpu.matmul %20, %21, %cst_12 {dimension_numbers = #tpu.dot_dimension_numbers<[1], [0], [0], [1], [0, 0, 1, 1], [], []>} : vector<16x128xbf16>, vector<128x32xbf16>, vector<16x32xf32> -> vector<16x32xf32>
    %23 = arith.addf %19, %22 : vector<16x32xf32>
    %c0_13 = arith.constant 0 : index
    %c0_14 = arith.constant 0 : index
    %24 = vector.load %arg12[%c0_13, %c0_14] : memref<16x32xf32, #tpu.memory_space<vmem>>, vector<16x32xf32>
    tpu.vector_store %arg12[%c0_13, %c0_14], %23 {strides = array<i32>} : memref<16x32xf32, #tpu.memory_space<vmem>>, vector<16x32xf32>,
    %c0_i32_15 = arith.constant 0 : i32
    %25 = arith.cmpi eq, %arg1, %c0_i32_15 : i32
    %26 = arith.extui %25 : i1 to i32
    %c0_i32_16 = arith.constant 0 : i32
    %27 = arith.cmpi ne, %26, %c0_i32_16 : i32
    scf.if %27 {
      %c0_17 = arith.constant 0 : index
      %c0_18 = arith.constant 0 : index
      %28 = vector.load %arg10[%c0_17, %c0_18] : memref<16x32xf32, #tpu.memory_space<vmem>>, vector<16x32xf32>
      %c0_19 = arith.constant 0 : index
      %c0_20 = arith.constant 0 : index
      %29 = vector.load %arg12[%c0_19, %c0_20] : memref<16x32xf32, #tpu.memory_space<vmem>>, vector<16x32xf32>
      %30 = arith.addf %28, %29 : vector<16x32xf32>
      %c0_21 = arith.constant 0 : index
      %c0_22 = arith.constant 0 : index
      %31 = vector.load %arg9[%c0_21, %c0_22] : memref<16x32xf32, #tpu.memory_space<vmem>>, vector<16x32xf32>
      tpu.vector_store %arg9[%c0_21, %c0_22], %30 {strides = array<i32>} : memref<16x32xf32, #tpu.memory_space<vmem>>, vector<16x32xf32>,
    } else {
    }
    return
  }
  func.func @transform_0(%arg0: i32, %arg1: i32) -> (i32, i32) {
    %c0_i32 = arith.constant 0 : i32
    %c0_i32_0 = arith.constant 0 : i32
    return %arg0, %c0_i32 : i32, i32
  }
  func.func @transform_1(%arg0: i32, %arg1: i32) -> (i32, i32) {
    %c0_i32 = arith.constant 0 : i32
    %c0_i32_0 = arith.constant 0 : i32
    return %arg0, %c0_i32 : i32, i32
  }
  func.func @transform_2(%arg0: i32, %arg1: i32) -> (i32, i32) {
    %c0_i32 = arith.constant 0 : i32
    %c0_i32_0 = arith.constant 0 : i32
    %c0_i32_1 = arith.constant 0 : i32
    return %c0_i32, %c0_i32_0 : i32, i32
  }
  func.func @transform_3(%arg0: i32, %arg1: i32) -> (i32, i32) {
    %c0_i32 = arith.constant 0 : i32
    %c0_i32_0 = arith.constant 0 : i32
    %c0_i32_1 = arith.constant 0 : i32
    return %c0_i32, %c0_i32_0 : i32, i32
  }
  func.func @transform_4(%arg0: i32, %arg1: i32) -> (i32, i32) {
    %c0_i32 = arith.constant 0 : i32
    %c0_i32_0 = arith.constant 0 : i32
    %c0_i32_1 = arith.constant 0 : i32
    return %c0_i32, %c0_i32_0 : i32, i32
  }
  func.func @transform_5(%arg0: i32, %arg1: i32) -> (i32, i32) {
    %c0_i32 = arith.constant 0 : i32
    %c0_i32_0 = arith.constant 0 : i32
    return %c0_i32, %arg1 : i32, i32
  }
  func.func @transform_6(%arg0: i32, %arg1: i32) -> (i32, i32) {
    %c0_i32 = arith.constant 0 : i32
    %c0_i32_0 = arith.constant 0 : i32
    return %arg1, %c0_i32 : i32, i32
  }
  func.func @transform_7(%arg0: i32, %arg1: i32) -> (i32, i32) {
    %c0_i32 = arith.constant 0 : i32
    %c0_i32_0 = arith.constant 0 : i32
    return %arg0, %c0_i32 : i32, i32
  }
}

module attributes {stable_mosaic.version = 11 : i64} {
  func.func @ln_head_kernel(%arg0: i32, %arg1: memref<2x32xf32, #tpu.memory_space<vmem>>, %arg2: memref<1x32xf32, #tpu.memory_space<vmem>>, %arg3: memref<1x32xf32, #tpu.memory_space<vmem>>, %arg4: memref<32x64xbf16, #tpu.memory_space<vmem>>, %arg5: memref<2x64xf32, #tpu.memory_space<vmem>>, %arg6: memref<2x32xbf16, #tpu.memory_space<vmem>>) attributes {dimension_semantics = [#tpu.dimension_semantics<arbitrary>], iteration_bounds = array<i64: 1>, scalar_prefetch = 0 : i64, scratch_operands = 1 : i64, tpu.core_type = #tpu.core_type<tc>, window_params = [{pipeline_mode = #tpu.pipeline_mode<synchronous>, transform_indices = @transform_0, window_bounds = array<i64: 2, 32>}, {pipeline_mode = #tpu.pipeline_mode<synchronous>, transform_indices = @transform_1, window_bounds = array<i64: 1, 32>}, {pipeline_mode = #tpu.pipeline_mode<synchronous>, transform_indices = @transform_2, window_bounds = array<i64: 1, 32>}, {transform_indices = @transform_3, window_bounds = array<i64: 32, 64>}, {transform_indices = @transform_4, window_bounds = array<i64: 2, 64>}]} {
    %c0_i32 = arith.constant 0 : i32
    %0 = arith.cmpi eq, %arg0, %c0_i32 : i32
    %1 = arith.extui %0 : i1 to i32
    %c0_i32_0 = arith.constant 0 : i32
    %2 = arith.cmpi ne, %1, %c0_i32_0 : i32
    scf.if %2 {
      %c0_6 = arith.constant 0 : index
      %c0_7 = arith.constant 0 : index
      %7 = vector.load %arg1[%c0_6, %c0_7] : memref<2x32xf32, #tpu.memory_space<vmem>>, vector<2x32xf32>
      %c0_8 = arith.constant 0 : index
      %c0_9 = arith.constant 0 : index
      %8 = vector.load %arg2[%c0_8, %c0_9] : memref<1x32xf32, #tpu.memory_space<vmem>>, vector<1x32xf32>
      %c0_10 = arith.constant 0 : index
      %c0_11 = arith.constant 0 : index
      %9 = vector.load %arg3[%c0_10, %c0_11] : memref<1x32xf32, #tpu.memory_space<vmem>>, vector<1x32xf32>
      %cst_12 = arith.constant dense<0.000000e+00> : vector<2xf32>
      %10 = vector.multi_reduction <add>, %7, %cst_12 [1] : vector<2x32xf32> to vector<2xf32>
      %11 = vector.shape_cast %10 : vector<2xf32> to vector<2x1xf32>
      %cst_13 = arith.constant 3.200000e+01 : f32
      %12 = vector.broadcast %cst_13 : f32 to vector<2x1xf32>
      %13 = arith.divf %11, %12 : vector<2x1xf32>
      %14 = vector.broadcast %13 : vector<2x1xf32> to vector<2x32xf32>
      %15 = arith.subf %7, %14 : vector<2x32xf32>
      %16 = arith.mulf %15, %15 : vector<2x32xf32>
      %cst_14 = arith.constant dense<0.000000e+00> : vector<2xf32>
      %17 = vector.multi_reduction <add>, %16, %cst_14 [1] : vector<2x32xf32> to vector<2xf32>
      %18 = vector.shape_cast %17 : vector<2xf32> to vector<2x1xf32>
      %cst_15 = arith.constant 3.200000e+01 : f32
      %19 = vector.broadcast %cst_15 : f32 to vector<2x1xf32>
      %20 = arith.divf %18, %19 : vector<2x1xf32>
      %21 = vector.broadcast %13 : vector<2x1xf32> to vector<2x32xf32>
      %22 = arith.subf %7, %21 : vector<2x32xf32>
      %cst_16 = arith.constant 9.99999974E-6 : f32
      %23 = vector.broadcast %cst_16 : f32 to vector<2x1xf32>
      %24 = arith.addf %20, %23 : vector<2x1xf32>
      %25 = math.rsqrt %24 : vector<2x1xf32>
      %26 = vector.broadcast %25 : vector<2x1xf32> to vector<2x32xf32>
      %27 = arith.mulf %22, %26 : vector<2x32xf32>
      %28 = vector.broadcast %8 : vector<1x32xf32> to vector<2x32xf32>
      %29 = arith.mulf %27, %28 : vector<2x32xf32>
      %30 = vector.broadcast %9 : vector<1x32xf32> to vector<2x32xf32>
      %31 = arith.addf %29, %30 : vector<2x32xf32>
      %32 = arith.truncf %31 : vector<2x32xf32> to vector<2x32xbf16>
      %c0_17 = arith.constant 0 : index
      %c0_18 = arith.constant 0 : index
      %33 = vector.load %arg6[%c0_17, %c0_18] : memref<2x32xbf16, #tpu.memory_space<vmem>>, vector<2x32xbf16>
      tpu.vector_store %arg6[%c0_17, %c0_18], %32 {strides = array<i32>} : memref<2x32xbf16, #tpu.memory_space<vmem>>, vector<2x32xbf16>,
    } else {
    }
    %c0 = arith.constant 0 : index
    %c0_1 = arith.constant 0 : index
    %3 = vector.load %arg6[%c0, %c0_1] : memref<2x32xbf16, #tpu.memory_space<vmem>>, vector<2x32xbf16>
    %c0_2 = arith.constant 0 : index
    %c0_3 = arith.constant 0 : index
    %4 = vector.load %arg4[%c0_2, %c0_3] : memref<32x64xbf16, #tpu.memory_space<vmem>>, vector<32x64xbf16>
    %cst = arith.constant dense<0.000000e+00> : vector<2x64xf32>
    %5 = tpu.matmul %3, %4, %cst {dimension_numbers = #tpu.dot_dimension_numbers<[1], [0], [0], [1], [0, 0, 1, 1], [], []>} : vector<2x32xbf16>, vector<32x64xbf16>, vector<2x64xf32> -> vector<2x64xf32>
    %c0_4 = arith.constant 0 : index
    %c0_5 = arith.constant 0 : index
    %6 = vector.load %arg5[%c0_4, %c0_5] : memref<2x64xf32, #tpu.memory_space<vmem>>, vector<2x64xf32>
    tpu.vector_store %arg5[%c0_4, %c0_5], %5 {strides = array<i32>} : memref<2x64xf32, #tpu.memory_space<vmem>>, vector<2x64xf32>,
    return
  }
  func.func @transform_0(%arg0: i32) -> (i32, i32) {
    %c0_i32 = arith.constant 0 : i32
    %c0_i32_0 = arith.constant 0 : i32
    %c0_i32_1 = arith.constant 0 : i32
    return %c0_i32, %c0_i32_0 : i32, i32
  }
  func.func @transform_1(%arg0: i32) -> (i32, i32) {
    %c0_i32 = arith.constant 0 : i32
    %c0_i32_0 = arith.constant 0 : i32
    %c0_i32_1 = arith.constant 0 : i32
    return %c0_i32, %c0_i32_0 : i32, i32
  }
  func.func @transform_2(%arg0: i32) -> (i32, i32) {
    %c0_i32 = arith.constant 0 : i32
    %c0_i32_0 = arith.constant 0 : i32
    %c0_i32_1 = arith.constant 0 : i32
    return %c0_i32, %c0_i32_0 : i32, i32
  }
  func.func @transform_3(%arg0: i32) -> (i32, i32) {
    %c0_i32 = arith.constant 0 : i32
    %c0_i32_0 = arith.constant 0 : i32
    return %c0_i32, %arg0 : i32, i32
  }
  func.func @transform_4(%arg0: i32) -> (i32, i32) {
    %c0_i32 = arith.constant 0 : i32
    %c0_i32_0 = arith.constant 0 : i32
    return %c0_i32, %arg0 : i32, i32
  }
}

</mosaic_0001>

<bundles_post_ra>
// kernel: transformer_forward.8
= control target key start
LH: loop header
LB: loop body
LE: loop exit
PB: predicated region body
PF: predicated region fallthrough
CT: control target
= control target key end

     0   :  { %s803_s22 = smov 0   ;;  %s805_s23 = smov 0   ;;  %s882_s0 = inlined_call_operand.<no memory space> [shape: s32[1], index: 0, kind: input, shape index: {}, may-alias: {0,1}]   ;;  %s883_s1 = inlined_call_operand.<no memory space> [shape: s32[1], index: 1, kind: input, shape index: {}, may-alias: {0,1}]   ;;  %s884_s2 = inlined_call_operand.vmem [shape: bf16[8,8,8], index: 2, kind: input, shape index: {}]   ;;  %s885_s3 = inlined_call_operand.vmem [shape: bf16[8,8,8], index: 3, kind: input, shape index: {}]   ;;  %s886_s4 = inlined_call_operand.vmem [shape: bf16[8,8,8], index: 4, kind: input, shape index: {}]   ;;  %s887_s5 = inlined_call_operand.vmem [shape: bf16[8,8,8], index: 5, kind: output, shape index: {}]  }
   0x1   :  { %10 = sst [smem:[#allocation6]] %s882_s0  ;;  %s807_s24 = smov 0  }
   0x2   :  { %11 = sst [smem:[#allocation7]] %s883_s1 }
   0x3 LB: > { %s29_s0 = sadd.s32 1, %s751_s23  ;;  %p648_p0 = scmp.ge.s32.totalorder %s755_s24, 1  ;;  %s755_s24 = sphi %s807_s24, %s17_s24   ;;  %s751_s23 = sphi %s805_s23, %s889_s23   ;;  %s747_s22 = sphi %s803_s22, %s888_s22  }
   0x4   : > { %p31_p1 = scmp.ge.s32.totalorder %s29_s0, 8  ;;  %p201_p2 = scmp.lt.s32.totalorder %s755_s24, 9 }
   0x6   : > { %s891_s0 = smov (%p31_p1, %s29_s0), 0  ;;  %p202_p3 = pnand %p648_p0, %p201_p2 }
   0x7   : > { %s821_s1 = sld [smem:[#allocation6]] (!%p202_p3)  ;;  %p248_p4 = scmp.lt.s32.totalorder (!%p202_p3), %s747_s22, 7 }
   0x8   : > { %205 = sbr.rel (%p202_p3) target bundleno = 1305 (0x519), region = 32  ;;  %s823_s25 = sld [smem:[#allocation7]] (!%p202_p3) }
   0xd   : > { %s893_s22 = smov (!%p248_p4, %s747_s22), 7  ;;  %p250_p5 = scmp.lt.s32.totalorder %s821_s1, 0 }
   0xe   : > { %p259_p6 = scmp.lt.s32.totalorder %s823_s25, 0  ;;  %p653_p7 = scmp.ne.s32.totalorder %s823_s25, 0 }
   0xf   : > { %s251_s26 = scalar_select %p250_p5, %s821_s1, 0 }
  0x10   : > { %s260_s27 = scalar_select %p259_p6, %s823_s25, 0 }
  0x11   : > { %s252_s28 = sadd.s32 %s251_s26, %s893_s22  ;;  %289 = sbr.rel (%p653_p7) target bundleno = 25 (0x19), region = 36 }
  0x12   : > { %s829_s29 = sshll.u32 %s252_s28, 2  ;;  %s261_s30 = sadd.s32 %s260_s27, %s893_s22 }
  0x13   : > { %s254_s8 = scalar_lea.vmem %s884_s2, %s829_s29  ;;  %s650_s9 = sshll.u32 %s261_s30, 2 }
  0x14   : > { %s263_s12 = scalar_lea.vmem %s885_s3, %s650_s9  ;;  %s841_s15 = scalar_lea.vmem %s886_s4, %s650_s9 }
  0x15   : > { %s281_s18 = scalar_lea.vmem %s887_s5, %s829_s29 }
  0x16   : > { %vm290_vm0 = vcmask 7168   ;;  %vm293_vm1 = vcmask 64512   ;;  %v757_v0 = vmov -1e+30   ;;  %v758_v1 = vmov 0.0  }
  0x17   : > { %291 = vst.msk [vmem:[#allocation2] sm:$0xff] %vm290_vm0, %v757_v0  ;;  %292 = vst.msk [vmem:[#allocation3] sm:$0xff] %vm290_vm0, %v758_v1 }
  0x18   : > { %294 = vst.msk [vmem:[#allocation4] sm:$0xff] %vm293_vm1, %v758_v1 }
  0x19 PF: > { %v296_v2 = vld [vmem:[%s263_s12] sm:$0xf]  ;;  %vm297_vm2 = vcmask 64512   ;;  %v759_v3 = vmov 0.0   ;;  %vm760_vm3 = vmmov 0   ;;  %p655_p8 = scmp.ge.s32.totalorder %s823_s25, %s821_s1 }
  0x1a   : > { %667 = vmatprep.subr.bf16.mxu0 %v759_v3  ;;  %v302_v4 = vsel %vm297_vm2, %v296_v2, 0  ;;  %669 = vmatprep.mubr.msk.bf16.mxu0 %vm760_vm3, %v759_v3  ;;  %v295_v5 = vld [vmem:[%s254_s8] sm:$0xf] }
  0x1b   : > { %668 = vmatpush3.bf16.xpose.msra.mxu0 %v302_v4 }
  0x22   : > { %670 = vmatmul.mubr.msk.bf16.vlgmr.msra.gmra.mxu0 %vm297_vm2, %v295_v5 }
  0xe2   : > { %v338_v6 = vpop.f32.mrf.mxu0 }
  0xe4   : > { %v671_v7 = vpop.f32.mrf.mxu0  ;;  %347 = sbr.rel (%p655_p8) target bundleno = 717 (0x2cd), region = 40 }
  0xe6   : > { %v341_v8 = vpop.f32.mrf.mxu0 }
  0xe8   : > { %v672_v9 = vpop.f32.mrf.mxu0 }
  0xe9   : > { %v349_v10 = vsel %vm297_vm2, %v338_v6, -inf  ;;  %v761_v11 = vmov 0   ;;  %v348_v12 = vld [vmem:[#allocation2] sm:$0xff]  ;;  %vm370_vm4 = vcmask 7168   ;;  %vm384_vm5 = vcmask 1043456   ;;  %v364_v27 = vld [vmem:[#allocation3] sm:$0xff] }
  0xea   : > { %350 = vmax.xlane.f32.xlu0 %v349_v10  ;;  %720 = vset.pattern.permute.xlu1 %v761_v11  ;;  %v380_v16 = vld [vmem:[%s841_s15] sm:$0xf]  ;;  %v762_v17 = vmov 0.0   ;;  %vm763_vm6 = vmmov 0   ;;  %v372_v31 = vld [vmem:[#allocation4] sm:$0xff] }
  0xeb   : > { %719 = vset.pattern.permute.xlu0 %v761_v11  ;;  %673 = vmatprep.subr.bf16.mxu0 %v762_v17  ;;  %v386_v18 = vsel %vm384_vm5, %v380_v16, 0 }
  0xec   : > { %675 = vmatprep.mubr.msk.bf16.mxu0 %vm763_vm6, %v762_v17  ;;  %674 = vmatpush3.bf16.msra.mxu0 %v386_v18 }
 0x173   : > { %v351_v13 = vpop.xlane.xlu0 %350 }
 0x174   : > { %v352_v14 = vmax.f32 %v348_v12, %v351_v13 }
 0x176   : > { %v353_v15 = vsub.f32 %v348_v12, %v352_v14  ;;  %430 = vst.msk [vmem:[#allocation2] sm:$0xff] %vm370_vm4, %v352_v14  ;;  %358 = vperm.xlu0 %719, %v352_v14  }
 0x178   : > { %v354_v23 = vmul.f32 1.442695, %v353_v15 }
 0x1f1   : > { %v359_v19 = vpop.permute.xlu0 %358 }
 0x1f2   : > { %v361_v20 = vsub.f32 %v338_v6, %v359_v19 }
 0x1f4   : > { %v362_v21 = vmul.f32 1.442695, %v361_v20 }
 0x1f6   : > { %721 = vpow2.f32 %v362_v21 }
 0x1f7   : > { %723 = vpow2.f32 %v354_v23 }
 0x203   : > { %v722_v22 = vpop.eup %721 }
 0x204   : > { %v366_v24 = vsel %vm297_vm2, %v722_v22, 0.0  ;;  %v379_v25 = vpack.c.bf16 %v722_v22, %v722_v22  ;;  %v724_v26 = vpop.eup %723 }
 0x205   : > { %367 = vadd.xlane.f32.xlu1 %v366_v24  ;;  %v365_v28 = vmul.f32 %v724_v26, %v364_v27 }
 0x206   : > { %676 = vmatmul.mubr.msk.bf16.vlgmr.msra.gmra.mxu0 %vm297_vm2, %v379_v25 }
 0x216   : > { %375 = vperm.xlu1 %720, %v724_v26  }
 0x28e   : > { %v368_v29 = vpop.xlane.xlu1 %367 }
 0x28f   : > { %v369_v30 = vadd.f32 %v368_v29, %v365_v28 }
 0x291   : > { %371 = vst.msk [vmem:[#allocation3] sm:$0xff] %vm370_vm4, %v369_v30 }
 0x292   : > { %v376_v32 = vpop.permute.xlu1 %375 }
 0x293   : > { %v378_v33 = vmul.f32 %v376_v32, %v372_v31 }
 0x2c6   : > { %v422_v34 = vpop.f32.mrf.mxu0 }
 0x2c7   : > { %v428_v35 = vadd.f32 %v422_v34, %v378_v33 }
 0x2c8   : > { %v677_v36 = vpop.f32.mrf.mxu0 }
 0x2c9   : > { %429 = vst.msk [vmem:[#allocation4] sm:$0xff] %vm297_vm2, %v428_v35 }
 0x2ca   : > { %v425_v37 = vpop.f32.mrf.mxu0 }
 0x2cc   : > { %v678_v38 = vpop.f32.mrf.mxu0 }
 0x2cd PF: > { %p657_p9 = scmp.ne.s32.totalorder %s823_s25, %s821_s1 }
 0x2cf   : > { %434 = sbr.rel (%p657_p9) target bundleno = 1305 (0x519), region = 44 }
 0x2d4   : > { %v435_v39 = vlaneseq  ;;  %v764_v44 = vmov 0   ;;  %v441_v45 = vld [vmem:[#allocation2] sm:$0xff]  ;;  %vm463_vm8 = vcmask 7168   ;;  %vm477_vm9 = vcmask 1043456   ;;  %v457_v60 = vld [vmem:[#allocation3] sm:$0xff]  ;;  %v465_v2 = vld [vmem:[#allocation4] sm:$0xff] }
 0x2d5   : > { %725 = vset.pattern.permute.xlu0 %v764_v44  ;;  %726 = vset.pattern.permute.xlu1 %v764_v44  ;;  %v473_v49 = vld [vmem:[%s841_s15] sm:$0xf]  ;;  %v765_v50 = vmov 0.0   ;;  %vm766_vm10 = vmmov 0   ;;  %vm534_vm11 = vcmask 60416  }
 0x2d6   : > { %v436_v40 = vshrl.u32 %v435_v39, 7  ;;  %v438_v41 = vand.u32 127, %v435_v39  ;;  %679 = vmatprep.subr.bf16.mxu0 %v765_v50  ;;  %v479_v51 = vsel %vm477_vm9, %v473_v49, 0  ;;  %681 = vmatprep.mubr.msk.bf16.mxu0 %vm766_vm10, %v765_v50 }
 0x2d7   : > { %680 = vmatpush3.bf16.msra.mxu0 %v479_v51 }
 0x2d8   : > { %vm439_vm7 = vcmp.le.s32.totalorder %v438_v41, %v436_v40 }
 0x2d9   : > { %v440_v42 = vsel %vm439_vm7, %v338_v6, -1e+30 }
 0x2da   : > { %v442_v43 = vsel %vm297_vm2, %v440_v42, -inf }
 0x2db   : > { %443 = vmax.xlane.f32.xlu0 %v442_v43 }
 0x364   : > { %v444_v46 = vpop.xlane.xlu0 %443 }
 0x365   : > { %v445_v47 = vmax.f32 %v441_v45, %v444_v46 }
 0x367   : > { %v446_v48 = vsub.f32 %v441_v45, %v445_v47  ;;  %523 = vst.msk [vmem:[#allocation2] sm:$0xff] %vm463_vm8, %v445_v47  ;;  %451 = vperm.xlu0 %725, %v445_v47  }
 0x369   : > { %v447_v56 = vmul.f32 1.442695, %v446_v48 }
 0x3e2   : > { %v452_v52 = vpop.permute.xlu0 %451 }
 0x3e3   : > { %v454_v53 = vsub.f32 %v440_v42, %v452_v52 }
 0x3e5   : > { %v455_v54 = vmul.f32 1.442695, %v454_v53 }
 0x3e7   : > { %727 = vpow2.f32 %v455_v54 }
 0x3e8   : > { %729 = vpow2.f32 %v447_v56 }
 0x3f4   : > { %v728_v55 = vpop.eup %727 }
 0x3f5   : > { %v459_v57 = vsel %vm297_vm2, %v728_v55, 0.0  ;;  %v472_v58 = vpack.c.bf16 %v728_v55, %v728_v55  ;;  %v730_v59 = vpop.eup %729 }
 0x3f6   : > { %460 = vadd.xlane.f32.xlu1 %v459_v57  ;;  %v458_v61 = vmul.f32 %v730_v59, %v457_v60 }
 0x3f7   : > { %682 = vmatmul.mubr.msk.bf16.vlgmr.msra.gmra.mxu0 %vm297_vm2, %v472_v58 }
 0x407   : > { %468 = vperm.xlu1 %726, %v730_v59  }
 0x47f   : > { %v461_v62 = vpop.xlane.xlu1 %460 }
 0x480   : > { %v462_v63 = vadd.f32 %v461_v62, %v458_v61 }
 0x482   : > { %464 = vst.msk [vmem:[#allocation3] sm:$0xff] %vm463_vm8, %v462_v63 }
 0x483   : > { %v469_v3 = vpop.permute.xlu1 %468 }
 0x484   : > { %v471_v4 = vmul.f32 %v469_v3, %v465_v2 }
 0x489   : > { %v524_v0 = vld [vmem:[#allocation3] sm:$0xff] }
 0x48a   : > { %731 = vrcp.f32 %v524_v0 }
 0x497   : > { %v732_v1 = vpop.eup %731 }
 0x498   : > { %529 = vperm.xlu1 %726, %v732_v1  }
 0x4b7   : > { %v515_v5 = vpop.f32.mrf.mxu0 }
 0x4b8   : > { %v521_v6 = vadd.f32 %v515_v5, %v471_v4 }
 0x4b9   : > { %v683_v7 = vpop.f32.mrf.mxu0 }
 0x4ba   : > { %522 = vst.msk [vmem:[#allocation4] sm:$0xff] %vm297_vm2, %v521_v6 }
 0x4bb   : > { %v518_v8 = vpop.f32.mrf.mxu0 }
 0x4bd   : > { %v684_v9 = vpop.f32.mrf.mxu0 }
 0x4c1   : > { %v526_v10 = vld [vmem:[#allocation4] sm:$0xff] }
 0x513   : > { %v530_v11 = vpop.permute.xlu1 %529 }
 0x514   : > { %v532_v12 = vmul.f32 %v530_v11, %v526_v10 }
 0x516   : > { %v533_v13 = vpack.c.bf16 %v532_v12, %v532_v12 }
 0x518   : > { %535 = vst.msk [vmem:[%s281_s18] sm:$0xf] %vm534_vm11, %v533_v13 }
 0x519 PF: > { %s17_s24 = sadd.s32 1, %s755_s24   ;;  %s888_s22 = smov %s751_s23 }
 0x51a   : > { %p14_p10 = scmp.ge.s32.totalorder %s17_s24, 10   ;;  %s889_s23 = smov %s891_s0 }
 0x51c   :  { %16 = sbr.rel (!%p14_p10) target bundleno = 3 (0x3), region = 80 }

// kernel: transformer_forward.7
= control target key start
LH: loop header
LB: loop body
LE: loop exit
PB: predicated region body
PF: predicated region fallthrough
CT: control target
= control target key end

     0   :  { %vm26_vm0 = vcmask 261120   ;;  %v198_v15 = vmov 0.0   ;;  %vm199_vm1 = vmmov 0   ;;  %vm78_vm2 = vcmask 257024   ;;  %s254_s0 = inlined_call_operand.vmem [shape: f32[16,32], index: 0, kind: input, shape index: {}]   ;;  %s255_s3 = inlined_call_operand.vmem [shape: bf16[32,96], index: 3, kind: input, shape index: {}]   ;;  %s256_s1 = inlined_call_operand.vmem [shape: f32[1,32], index: 1, kind: input, shape index: {}]   ;;  %s257_s2 = inlined_call_operand.vmem [shape: f32[1,32], index: 2, kind: input, shape index: {}]   ;;  %s258_s4 = inlined_call_operand.vmem [shape: bf16[16,96], index: 4, kind: output, shape index: {}]  }
   0x1   :  { %v22_v0 = vld [vmem:[%s254_s0] sm:$0xff]  ;;  %v23_v1 = vld [vmem:[%s254_s0 + $0x8] sm:$0xff]  ;;  %181 = vmatprep.subr.bf16.mxu0 %v198_v15  ;;  %185 = vmatprep.mubr.msk.bf16.mxu0 %vm199_vm1, %v198_v15  ;;  %vm157_vm3 = vcmask 781312  }
   0x2   :  { %v27_v2 = vsel %vm26_vm0, %v22_v0, 0.0  ;;  %v30_v3 = vsel %vm26_vm0, %v23_v1, 0.0  ;;  %v191_v14 = vld [vmem:[%s255_s3 + $0x8] sm:$0xff]   ;;  %v192_v16 = vld [vmem:[%s255_s3] sm:$0xff]  }
   0x3   :  { %28 = vadd.xlane.f32.xlu0 %v27_v2  ;;  %182 = vmatpush3.bf16.msra.mxu0 %v191_v14  ;;  %v164_v24 = vld [vmem:[%s256_s1] ss:$0 sm:$0xff] }
   0x4   :  { %183 = vmatprep.subr.bf16.mxu0 %v198_v15  ;;  %v165_v26 = vld [vmem:[%s257_s2] ss:$0 sm:$0xff] }
   0x7   :  { %31 = vadd.xlane.f32.xlu0 %v30_v3  ;;  %184 = vmatpush3.bf16.msra.mxu0 %v192_v16 }
  0x8c   :  { %v29_v4 = vpop.xlane.xlu0 %28 }
  0x8d   :  { %v34_v5 = vmul.f32 0.03125, %v29_v4 }
  0x8f   :  { %v36_v6 = vsub.f32 %v22_v0, %v34_v5 }
  0x90   :  { %v32_v7 = vpop.xlane.xlu0 %31 }
  0x91   :  { %v35_v8 = vmul.f32 0.03125, %v32_v7  ;;  %v38_v9 = vmul.f32 %v36_v6, %v36_v6 }
  0x93   :  { %v37_v10 = vsub.f32 %v23_v1, %v35_v8  ;;  %v40_v11 = vsel %vm26_vm0, %v38_v9, 0.0 }
  0x94   :  { %41 = vadd.xlane.f32.xlu1 %v40_v11 }
  0x95   :  { %v39_v12 = vmul.f32 %v37_v10, %v37_v10 }
  0x97   :  { %v43_v13 = vsel %vm26_vm0, %v39_v12, 0.0 }
  0x98   :  { %44 = vadd.xlane.f32.xlu1 %v43_v13 }
 0x11d   :  { %v42_v17 = vpop.xlane.xlu1 %41 }
 0x11e   :  { %v46_v18 = vmul.f32 0.03125, %v42_v17 }
 0x120   :  { %v48_v19 = vadd.f32 1e-05, %v46_v18 }
 0x121   :  { %v45_v20 = vpop.xlane.xlu1 %44 }
 0x122   :  { %194 = vrsqrt.f32 %v48_v19  ;;  %v47_v21 = vmul.f32 0.03125, %v45_v20 }
 0x124   :  { %v49_v22 = vadd.f32 1e-05, %v47_v21 }
 0x126   :  { %196 = vrsqrt.f32 %v49_v22 }
 0x12f   :  { %v195_v23 = vpop.eup %194 }
 0x130   :  { %v52_v25 = vmul.f32 %v195_v23, %v36_v6 }
 0x132   :  { %v60_v27 = vmul.f32 %v164_v24, %v52_v25 }
 0x133   :  { %v197_v28 = vpop.eup %196 }
 0x134   :  { %v68_v29 = vadd.f32 %v165_v26, %v60_v27  ;;  %v53_v30 = vmul.f32 %v197_v28, %v37_v10 }
 0x136   :  { %v174_v31 = vpack.c.bf16 %v68_v29, %v68_v29  ;;  %v61_v32 = vmul.f32 %v164_v24, %v53_v30 }
 0x138   :  { %79 = vst.msk [vmem:[#allocation2] sm:$0xf] %vm78_vm2, %v174_v31  ;;  %v69_v33 = vadd.f32 %v165_v26, %v61_v32 }
 0x13a   :  { %v175_v34 = vpack.c.bf16 %v69_v33, %v69_v33 }
 0x13c   :  { %80 = vst.msk [vmem:[#allocation2 + $0x4] sm:$0xf] %vm78_vm2, %v175_v34 }
 0x143   :  { %v193_v35 = vld [vmem:[#allocation2] sm:$0xff]  }
 0x144   :  { %186 = vmatmul.mubr.msk.bf16.vlgmr.msra.gmra.mxu0 %vm26_vm0, %v193_v35 }
 0x204   :  { %v142_v36 = vpop.f32.mrf.mxu0 }
 0x205   :  { %v176_v37 = vpack.c.bf16 %v142_v36, %v142_v36 }
 0x206   :  { %v187_v38 = vpop.f32.mrf.mxu0 }
 0x207   :  { %158 = vst.msk [vmem:[%s258_s4] sm:$0xf] %vm157_vm3, %v176_v37 }
 0x208   :  { %v145_v39 = vpop.f32.mrf.mxu0 }
 0x209   :  { %v177_v40 = vpack.c.bf16 %v145_v39, %v145_v39 }
 0x20a   :  { %v188_v41 = vpop.f32.mrf.mxu0 }
 0x20b   :  { %159 = vst.msk [vmem:[%s258_s4 + $0x4] sm:$0xf] %vm157_vm3, %v177_v40 }

// kernel: transformer_forward.9
= control target key start
LH: loop header
LB: loop body
LE: loop exit
PB: predicated region body
PF: predicated region fallthrough
CT: control target
= control target key end

     0   :  { %vm56_vm0 = vcmask 261120   ;;  %v473_v0 = vmov 0.0   ;;  %vm474_vm1 = vmmov 0   ;;  %vm158_vm2 = vcmask 257024   ;;  %s603_s2 = inlined_call_operand.vmem [shape: bf16[32,32], index: 2, kind: input, shape index: {}]   ;;  %s604_s0 = inlined_call_operand.vmem [shape: bf16[16,32], index: 0, kind: input, shape index: {}]   ;;  %s605_s1 = inlined_call_operand.vmem [shape: f32[16,32], index: 1, kind: input, shape index: {}, may-alias: {1,7}]   ;;  %s606_s5 = inlined_call_operand.vmem [shape: bf16[32,128], index: 5, kind: input, shape index: {}]   ;;  %s607_s3 = inlined_call_operand.vmem [shape: f32[1,32], index: 3, kind: input, shape index: {}]   ;;  %s608_s4 = inlined_call_operand.vmem [shape: f32[1,32], index: 4, kind: input, shape index: {}]   ;;  %s609_s6 = inlined_call_operand.vmem [shape: bf16[128,32], index: 6, kind: input, shape index: {}]   ;;  %s610_s7 = inlined_call_operand.vmem [shape: f32[16,32], index: 7, kind: output, shape index: {}, may-alias: {1,7}]  }
   0x1   :  { %413 = vmatprep.subr.bf16.mxu1 %v473_v0  ;;  %v451_v1 = vld [vmem:[%s603_s2 + $0x8] sm:$0xff]   ;;  %417 = vmatprep.mubr.msk.bf16.mxu1 %vm474_vm1, %v473_v0  ;;  %161 = vst.msk [vmem:[#allocation4] sm:$0xff] %vm56_vm0, %v473_v0  ;;  %162 = vst.msk [vmem:[#allocation4 + $0x8] sm:$0xff] %vm56_vm0, %v473_v0  ;;  %v452_v2 = vld [vmem:[%s603_s2] sm:$0xff]  }
   0x2   :  { %429 = vmatprep.subr.bf16.mxu0 %v473_v0  ;;  %445 = vmatprep.mubr.msk.bf16.mxu0 %vm474_vm1, %v473_v0  ;;  %v453_v3 = vld [vmem:[%s604_s0] sm:$0xff]   ;;  %v32_v8 = vld [vmem:[%s605_s1 + $0x8] sm:$0xff]  ;;  %v457_v45 = vld [vmem:[%s609_s6 + $0x38] sm:$0xff]  }
   0x3   :  { %414 = vmatpush3.bf16.msra.mxu1 %v451_v1  ;;  %v31_v4 = vld [vmem:[%s605_s1] sm:$0xff]  ;;  %v454_v24 = vld [vmem:[%s606_s5 + $0x8] sm:$0xff]   ;;  %430 = vmatpush3.bf16.msra.mxu0 %v457_v45  ;;  %v458_v46 = vld [vmem:[%s609_s6 + $0x30] sm:$0xff]  }
   0x4   :  { %415 = vmatprep.subr.bf16.mxu1 %v473_v0  ;;  %v455_v25 = vld [vmem:[%s606_s5] sm:$0xff]   ;;  %431 = vmatprep.subr.bf16.mxu0 %v473_v0  ;;  %v459_v47 = vld [vmem:[%s609_s6 + $0x28] sm:$0xff]   ;;  %v461_v49 = vld [vmem:[%s609_s6 + $0x18] sm:$0xff]  }
   0x5   :  { %v380_v33 = vld [vmem:[%s607_s3] ss:$0 sm:$0xff]  ;;  %v462_v50 = vld [vmem:[%s609_s6 + $0x10] sm:$0xff]   ;;  %v463_v51 = vld [vmem:[%s609_s6 + $0x8] sm:$0xff]  }
   0x6   :  { %v381_v35 = vld [vmem:[%s608_s4] ss:$0 sm:$0xff] }
   0x7   :  { %416 = vmatpush3.bf16.msra.mxu1 %v452_v2  ;;  %432 = vmatpush3.bf16.msra.mxu0 %v458_v46  ;;  %v460_v48 = vld [vmem:[%s609_s6 + $0x20] sm:$0xff]  }
   0x8   :  { %421 = vmatprep.subr.bf16.mxu1 %v473_v0  ;;  %433 = vmatprep.subr.bf16.mxu0 %v473_v0  ;;  %v464_v52 = vld [vmem:[%s609_s6] sm:$0xff]  }
   0xa   :  { %418 = vmatmul.mubr.msk.bf16.vlgmr.msra.gmra.mxu1 %vm56_vm0, %v453_v3 }
   0xb   :  { %425 = vmatprep.mubr.msk.bf16.mxu1 %vm474_vm1, %v473_v0  ;;  %422 = vmatpush3.bf16.msra.mxu1 %v454_v24 }
   0xc   :  { %423 = vmatprep.subr.bf16.mxu1 %v473_v0  ;;  %434 = vmatpush3.bf16.msra.mxu0 %v459_v47 }
   0xd   :  { %435 = vmatprep.subr.bf16.mxu0 %v473_v0 }
   0xf   :  { %424 = vmatpush3.bf16.msra.mxu1 %v455_v25 }
  0x10   :  { %436 = vmatpush3.bf16.msra.mxu0 %v460_v48 }
  0x11   :  { %437 = vmatprep.subr.bf16.mxu0 %v473_v0 }
  0x14   :  { %438 = vmatpush3.bf16.msra.mxu0 %v461_v49 }
  0x15   :  { %439 = vmatprep.subr.bf16.mxu0 %v473_v0 }
  0x18   :  { %440 = vmatpush3.bf16.msra.mxu0 %v462_v50 }
  0x19   :  { %441 = vmatprep.subr.bf16.mxu0 %v473_v0 }
  0x1c   :  { %442 = vmatpush3.bf16.msra.mxu0 %v463_v51 }
  0x1d   :  { %443 = vmatprep.subr.bf16.mxu0 %v473_v0 }
  0x20   :  { %444 = vmatpush3.bf16.msra.mxu0 %v464_v52 }
  0xca   :  { %v94_v5 = vpop.f32.mrf.mxu1 }
  0xcb   :  { %v101_v6 = vadd.f32 %v94_v5, %v31_v4 }
  0xcc   :  { %v419_v7 = vpop.f32.mrf.mxu1 }
  0xcd   :  { %103 = vst.msk [vmem:[#allocation2] sm:$0xff] %vm56_vm0, %v101_v6  ;;  %v107_v9 = vsel %vm56_vm0, %v101_v6, 0.0 }
  0xce   :  { %108 = vadd.xlane.f32.xlu0 %v107_v9  ;;  %v97_v10 = vpop.f32.mrf.mxu1 }
  0xcf   :  { %v102_v11 = vadd.f32 %v97_v10, %v32_v8 }
  0xd0   :  { %v420_v12 = vpop.f32.mrf.mxu1 }
  0xd1   :  { %104 = vst.msk [vmem:[#allocation2 + $0x8] sm:$0xff] %vm56_vm0, %v102_v11  ;;  %v110_v13 = vsel %vm56_vm0, %v102_v11, 0.0  ;;  %v249_v12 = vld [vmem:[#allocation4] sm:$0xff] }
  0xd2   :  { %111 = vadd.xlane.f32.xlu0 %v110_v13 }
 0x157   :  { %v109_v14 = vpop.xlane.xlu0 %108 }
 0x158   :  { %v114_v15 = vmul.f32 0.03125, %v109_v14 }
 0x15a   :  { %v116_v16 = vsub.f32 %v101_v6, %v114_v15 }
 0x15b   :  { %v112_v17 = vpop.xlane.xlu0 %111 }
 0x15c   :  { %v115_v18 = vmul.f32 0.03125, %v112_v17  ;;  %v118_v19 = vmul.f32 %v116_v16, %v116_v16 }
 0x15e   :  { %v117_v20 = vsub.f32 %v102_v11, %v115_v18  ;;  %v120_v21 = vsel %vm56_vm0, %v118_v19, 0.0 }
 0x15f   :  { %121 = vadd.xlane.f32.xlu1 %v120_v21 }
 0x160   :  { %v119_v22 = vmul.f32 %v117_v20, %v117_v20 }
 0x162   :  { %v123_v23 = vsel %vm56_vm0, %v119_v22, 0.0 }
 0x163   :  { %124 = vadd.xlane.f32.xlu1 %v123_v23  ;;  %v365_v23 = vld [vmem:[#allocation2 + $0x8] sm:$0xff] }
 0x1e8   :  { %v122_v26 = vpop.xlane.xlu1 %121 }
 0x1e9   :  { %v126_v27 = vmul.f32 0.03125, %v122_v26 }
 0x1eb   :  { %v128_v28 = vadd.f32 1e-05, %v126_v27 }
 0x1ec   :  { %v125_v29 = vpop.xlane.xlu1 %124 }
 0x1ed   :  { %465 = vrsqrt.f32 %v128_v28  ;;  %v127_v30 = vmul.f32 0.03125, %v125_v29 }
 0x1ef   :  { %v129_v31 = vadd.f32 1e-05, %v127_v30 }
 0x1f1   :  { %467 = vrsqrt.f32 %v129_v31 }
 0x1fa   :  { %v466_v32 = vpop.eup %465 }
 0x1fb   :  { %v132_v34 = vmul.f32 %v466_v32, %v116_v16  ;;  %v250_v16 = vld [vmem:[#allocation4 + $0x8] sm:$0xff] }
 0x1fd   :  { %v140_v36 = vmul.f32 %v380_v33, %v132_v34 }
 0x1fe   :  { %v468_v37 = vpop.eup %467 }
 0x1ff   :  { %v148_v38 = vadd.f32 %v381_v35, %v140_v36  ;;  %v133_v39 = vmul.f32 %v468_v37, %v117_v20  ;;  %v364_v20 = vld [vmem:[#allocation2] sm:$0xff] }
 0x201   :  { %v396_v40 = vpack.c.bf16 %v148_v38, %v148_v38  ;;  %v141_v41 = vmul.f32 %v380_v33, %v133_v39 }
 0x203   :  { %159 = vst.msk [vmem:[#allocation3] sm:$0xf] %vm158_vm2, %v396_v40  ;;  %v149_v42 = vadd.f32 %v381_v35, %v141_v41 }
 0x205   :  { %v397_v43 = vpack.c.bf16 %v149_v42, %v149_v42 }
 0x207   :  { %160 = vst.msk [vmem:[#allocation3 + $0x4] sm:$0xf] %vm158_vm2, %v397_v43 }
 0x20e   :  { %v456_v44 = vld [vmem:[#allocation3] sm:$0xff]  }
 0x20f   :  { %426 = vmatmul.mubr.msk.bf16.vlgmr.msra.gmra.mxu1 %vm56_vm0, %v456_v44 }
 0x2cf   :  { %v224_v53 = vpop.f32.mrf.mxu1 }
 0x2d0   :  { %v231_v54 = vmul.f32 %v224_v53, %v224_v53 }
 0x2d1   :  { %v427_v55 = vpop.f32.mrf.mxu1 }
 0x2d2   :  { %v233_v56 = vmul.f32 %v231_v54, %v224_v53 }
 0x2d3   :  { %v227_v57 = vpop.f32.mrf.mxu1 }
 0x2d4   :  { %v235_v58 = vmul.f32 0.044715, %v233_v56  ;;  %v232_v59 = vmul.f32 %v227_v57, %v227_v57 }
 0x2d5   :  { %v428_v60 = vpop.f32.mrf.mxu1 }
 0x2d6   :  { %v237_v61 = vadd.f32 %v235_v58, %v224_v53  ;;  %v234_v62 = vmul.f32 %v232_v59, %v227_v57 }
 0x2d8   :  { %v239_v63 = vmul.f32 0.7978846, %v237_v61  ;;  %v236_v1 = vmul.f32 0.044715, %v234_v62 }
 0x2da   :  { %469 = vtanh.f32 %v239_v63  ;;  %v238_v2 = vadd.f32 %v236_v1, %v227_v57 }
 0x2dc   :  { %v240_v0 = vmul.f32 0.7978846, %v238_v2 }
 0x2de   :  { %471 = vtanh.f32 %v240_v0 }
 0x2e7   :  { %v470_v3 = vpop.eup %469 }
 0x2e8   :  { %v243_v4 = vadd.f32 1.0, %v470_v3 }
 0x2ea   :  { %v245_v6 = vmul.f32 0.5, %v243_v4 }
 0x2eb   :  { %v472_v5 = vpop.eup %471 }
 0x2ec   :  { %v244_v7 = vadd.f32 1.0, %v472_v5  ;;  %v247_v9 = vmul.f32 %v245_v6, %v224_v53 }
 0x2ee   :  { %v246_v8 = vmul.f32 0.5, %v244_v7 }
 0x2f0   :  { %v248_v10 = vmul.f32 %v246_v8, %v227_v57 }
 0x2f2   :  { %v251_v11 = vpack.c.bf16 %v248_v10, %v247_v9 }
 0x2f4   :  { %446 = vmatmul.mubr.bf16.vlgmr.msra.gmra.mxu0 %v251_v11 }
 0x3b4   :  { %v350_v13 = vpop.f32.mrf.mxu0 }
 0x3b5   :  { %v357_v14 = vadd.f32 %v350_v13, %v249_v12 }
 0x3b6   :  { %v447_v15 = vpop.f32.mrf.mxu0 }
 0x3b7   :  { %359 = vst.msk [vmem:[#allocation4] sm:$0xff] %vm56_vm0, %v357_v14 }
 0x3b8   :  { %v353_v17 = vpop.f32.mrf.mxu0 }
 0x3b9   :  { %v358_v18 = vadd.f32 %v353_v17, %v250_v16 }
 0x3ba   :  { %v448_v19 = vpop.f32.mrf.mxu0 }
 0x3bb   :  { %360 = vst.msk [vmem:[#allocation4 + $0x8] sm:$0xff] %vm56_vm0, %v358_v18 }
 0x3be   :  { %v366_v21 = vld [vmem:[#allocation4] sm:$0xff] }
 0x3bf   :  { %v368_v22 = vadd.f32 %v366_v21, %v364_v20 }
 0x3c1   :  { %370 = vst.msk [vmem:[%s610_s7] sm:$0xff] %vm56_vm0, %v368_v22 }
 0x3c2   :  { %v367_v24 = vld [vmem:[#allocation4 + $0x8] sm:$0xff] }
 0x3c3   :  { %v369_v25 = vadd.f32 %v367_v24, %v365_v23 }
 0x3c5   :  { %371 = vst.msk [vmem:[%s610_s7 + $0x8] sm:$0xff] %vm56_vm0, %v369_v25 }

// kernel: transformer_forward.13
= control target key start
LH: loop header
LB: loop body
LE: loop exit
PB: predicated region body
PF: predicated region fallthrough
CT: control target
= control target key end

     0   :  { %vm26_vm0 = vcmask 254976   ;;  %s226_s0 = inlined_call_operand.vmem [shape: f32[2,32], index: 0, kind: input, shape index: {}]   ;;  %s227_s1 = inlined_call_operand.vmem [shape: f32[1,32], index: 1, kind: input, shape index: {}]   ;;  %s228_s2 = inlined_call_operand.vmem [shape: f32[1,32], index: 2, kind: input, shape index: {}]   ;;  %s229_s3 = inlined_call_operand.vmem [shape: bf16[32,64], index: 3, kind: input, shape index: {}]   ;;  %s230_s4 = inlined_call_operand.hbm [shape: f32[2,64], index: 4, kind: output, shape index: {}]  }
   0x1   :  { %v23_v0 = vld [vmem:[%s226_s0] sm:$0x3] }
   0x2   :  { %v27_v1 = vsel %vm26_vm0, %v23_v0, 0.0 }
   0x3   :  { %28 = vadd.xlane.f32.xlu0 %v27_v1 }
   0x4   :  { %9 = vsyncpa [#allocation4], 0  ;;  %v154_v7 = vld [vmem:[%s229_s3 + $0x8] sm:$0xff]   ;;  %v180_v8 = vmov 0.0   ;;  %v155_v9 = vld [vmem:[%s229_s3] sm:$0xff]   ;;  %vm181_vm1 = vmmov 0  }
   0x5   :  { %143 = vmatprep.subr.bf16.mxu0 %v180_v8  ;;  %147 = vmatprep.mubr.msk.bf16.mxu0 %vm181_vm1, %v180_v8  ;;  %v135_v14 = vld [vmem:[%s227_s1] ss:$0 sm:$0xff]  ;;  %vm56_vm2 = vcmask 253952   ;;  %vm75_vm3 = vcmask 261120   ;;  %s182_s3 = smov [#allocation3]   ;;  %vm119_vm4 = vcmask 517120  }
   0x6   :  { %144 = vmatpush3.bf16.msra.mxu0 %v154_v7  ;;  %v136_v16 = vld [vmem:[%s228_s2] ss:$0 sm:$0xff]  ;;  %s127_s24 = sshll.u32 %s182_s3, 4  ;;  %s128_s24 = int_to_ptr.vmem [resolvable:$true] %s127_s24 }
   0x7   :  { %145 = vmatprep.subr.bf16.mxu0 %v180_v8  ;;  %s158_s1 = scalar_lea.vmem %s128_s24, 32  ;;  %p163_p1 = scmp.lt.s32.totalorder %s128_s24, %s128_s24 }
   0x8   :  { %p159_p0 = scmp.ne.s32.totalorder %s128_s24, %s158_s1  ;;  %p164_p2 = scmp.lt.s32.totalorder %s158_s1, %s158_s1 }
   0xa   :  { %146 = vmatpush3.bf16.msra.mxu0 %v155_v9  ;;  %p165_p3 = por %p164_p2, %p163_p1 }
   0xc   :  { %p166_p4 = pnand %p165_p3, %p159_p0 }
  0x8c   :  { %v29_v2 = vpop.xlane.xlu0 %28 }
  0x8d   :  { %v31_v3 = vmul.f32 0.03125, %v29_v2 }
  0x8f   :  { %v32_v4 = vsub.f32 %v23_v0, %v31_v3 }
  0x91   :  { %v33_v5 = vmul.f32 %v32_v4, %v32_v4 }
  0x93   :  { %v34_v6 = vsel %vm26_vm0, %v33_v5, 0.0 }
  0x94   :  { %35 = vadd.xlane.f32.xlu0 %v34_v6 }
 0x11d   :  { %v36_v10 = vpop.xlane.xlu0 %35 }
 0x11e   :  { %v37_v11 = vmul.f32 0.03125, %v36_v10 }
 0x120   :  { %v38_v12 = vadd.f32 1e-05, %v37_v11 }
 0x122   :  { %156 = vrsqrt.f32 %v38_v12 }
 0x12f   :  { %v157_v13 = vpop.eup %156 }
 0x130   :  { %v40_v15 = vmul.f32 %v157_v13, %v32_v4 }
 0x132   :  { %v47_v17 = vmul.f32 %v135_v14, %v40_v15 }
 0x134   :  { %v54_v18 = vadd.f32 %v136_v16, %v47_v17 }
 0x136   :  { %v55_v19 = vpack.c.bf16 %v54_v18, %v54_v18 }
 0x138   :  { %57 = vst.msk [vmem:[#allocation2] sm:$0x1] %vm56_vm2, %v55_v19 }
 0x13f   :  { %v58_v20 = vld [vmem:[#allocation2] sm:$0x1] }
 0x140   :  { %148 = vmatmul.mubr.msk.bf16.vlgmr.msra.gmra.mxu0 %vm75_vm3, %v58_v20 }
 0x200   :  { %v113_v21 = vpop.f32.mrf.mxu0 }
 0x201   :  { %120 = vst.msk [vmem:[#allocation3] sm:$0x3] %vm119_vm4, %v113_v21 }
 0x202   :  { %v149_v22 = vpop.f32.mrf.mxu0 }
 0x203   :  { %169 = shalt.err (!%p166_p4)
}
 0x204   :  { %130 = dma.vmem_to_hbm [thread:$0]  %s128_s24, 32, %s230_s4, [#allocation4]   ;;  %v116_v23 = vpop.f32.mrf.mxu0 }
 0x206   :  { %v150_v24 = vpop.f32.mrf.mxu0 }
 0x207   :  { %178 = dma.done.wait [#allocation4], 32  }
 0x208   :  { %179 = vsyncadd [#allocation4], 4294967264 }
 0x209   :  { %134 = vsyncpa [#allocation4], 1 }

</bundles_post_ra>
